<compile_context>
chip_gen: v7x
topology: tpu7x:2x2x1
jax: 0.10.0
libtpu: 0.0.40
codegen_flags: <defaults>
</compile_context>

<pallas_src>
import functools
import math

import jax
import jax.numpy as jnp
from jax import lax
from jax.experimental import pallas as pl
from jax.experimental.pallas import tpu as pltpu


_LAYER_KEYS = ("in_proj_w", "in_proj_b", "out_w", "out_b",
               "ln1_g", "ln1_b", "ff1_w", "ff1_b", "ff2_w", "ff2_b",
               "ln2_g", "ln2_b")
_LN_EPS = 1e-5


# ------------------------------ fused kernel --------------------------------

def _add_layernorm(x, y, gamma, beta):
    z = x + y
    mu = jnp.mean(z, axis=-1, keepdims=True)
    var = jnp.mean(jnp.square(z - mu), axis=-1, keepdims=True)
    return (z - mu) * lax.rsqrt(var + _LN_EPS) * gamma + beta


def _t2e_fused_kernel(*refs, tb, seq, nhead, num_layers, use_type):
    # refs = (*inputs, out_ref); no VMEM scratch needed.
    *in_refs, out_ref = refs
    it = iter(in_refs)
    emb_ref = next(it)                              # (TB, S, Et)  bf16
    temb_ref = next(it) if use_type else None       # (TB, 1, Et)  bf16
    th_w, th_b = next(it), next(it)
    if use_type:
        tf_w, tf_b = next(it), next(it)
    layers = [tuple(next(it) for _ in range(len(_LAYER_KEYS)))
              for _ in range(num_layers)]
    lg1_w, lg1_b, lg2_w, lg2_b = next(it), next(it), next(it), next(it)

    Et = emb_ref.shape[-1]
    rows = tb * seq

    # title_hidden: big (rows, Et) @ (Et, D) bf16 matmul, f32 accumulate
    emb = emb_ref[...].reshape(rows, Et)
    x = jnp.dot(emb, th_w[...], preferred_element_type=jnp.float32) + th_b[...]
    D = x.shape[-1]

    if use_type:
        # API-type conditioning: (TB, Et) @ (Et, D), broadcast over the sequence axis
        t = jnp.dot(temb_ref[...].reshape(tb, Et), tf_w[...],
                    preferred_element_type=jnp.float32) + tf_b[...]       # (TB, D)
        x = (x.reshape(tb, seq, D) + t[:, None, :]).reshape(rows, D)

    Dh = D // nhead
    scale = 1.0 / math.sqrt(Dh)

    # 2x post-norm TransformerEncoderLayer (dropout = identity in eval mode)
    for (inp_w, inp_b, out_w, out_b, ln1_g, ln1_b,
         ff1_w, ff1_b, ff2_w, ff2_b, ln2_g, ln2_b) in layers:
        qkv = jnp.dot(x.astype(jnp.bfloat16), inp_w[...],
                      preferred_element_type=jnp.float32) + inp_b[...]    # (rows, 3D)

        head_outs = []
        for h in range(nhead):                      # nhead=2, static; stays in vregs
            q = qkv[:, h * Dh:(h + 1) * Dh].reshape(tb, seq, Dh).astype(jnp.bfloat16)
            k = qkv[:, D + h * Dh:D + (h + 1) * Dh].reshape(tb, seq, Dh).astype(jnp.bfloat16)
            v = qkv[:, 2 * D + h * Dh:2 * D + (h + 1) * Dh].reshape(tb, seq, Dh).astype(jnp.bfloat16)
            # per-sequence (block-diagonal) attention: batch dim = TB sequences
            s = lax.dot_general(q, k, (((2,), (2,)), ((0,), (0,))),
                                preferred_element_type=jnp.float32) * scale   # (TB,S,S)
            s = s - jnp.max(s, axis=-1, keepdims=True)
            p = jnp.exp(s)
            p = p * pl.reciprocal(jnp.sum(p, axis=-1, keepdims=True), approx=True)
            o = lax.dot_general(p.astype(jnp.bfloat16), v,
                                (((2,), (1,)), ((0,), (0,))),
                                preferred_element_type=jnp.float32)           # (TB,S,Dh)
            head_outs.append(o.reshape(rows, Dh))
        attn = jnp.concatenate(head_outs, axis=-1)                            # (rows, D)

        o = jnp.dot(attn.astype(jnp.bfloat16), out_w[...],
                    preferred_element_type=jnp.float32) + out_b[...]
        x = _add_layernorm(x, o, ln1_g[...], ln1_b[...])

        hdn = jnp.dot(x.astype(jnp.bfloat16), ff1_w[...],
                      preferred_element_type=jnp.float32) + ff1_b[...]
        hdn = jnp.maximum(hdn, 0.0)                                           # relu
        hdn = jnp.dot(hdn.astype(jnp.bfloat16), ff2_w[...],
                      preferred_element_type=jnp.float32) + ff2_b[...]
        x = _add_layernorm(x, hdn, ln2_g[...], ln2_b[...])

    # dropout_layer_T2E: identity (eval).  logits: Linear -> LeakyReLU -> Linear.
    h1 = jnp.dot(x.astype(jnp.bfloat16), lg1_w[...],
                 preferred_element_type=jnp.float32) + lg1_b[...]
    h1 = jnp.where(h1 >= 0.0, h1, 0.01 * h1)           # nn.LeakyReLU default slope
    out = jnp.dot(h1.astype(jnp.bfloat16), lg2_w[...],
                  preferred_element_type=jnp.float32) + lg2_b[...]            # (rows, A_pad)
    out_ref[...] = out.reshape(tb, seq, -1).astype(out_ref.dtype)


# ----------------------------- parameter setup ------------------------------

def init_params(key, *, vocab, title_emb_size, hidden_size, apisets_emsize,
                ttype_len, nhead=2, num_layers=2):
    # NOTE: a loader from PyTorch weights must transpose nn.Linear.weight and MHA
    # in_proj_weight to (Din, Dout) and cast matmul weights to bfloat16.
    D = hidden_size * 2            # transformer d_model
    dff = hidden_size              # dim_feedforward
    ks = iter(jax.random.split(key, 64))

    def mat(shape, scale=0.02):    # MXU operand -> bf16
        return (scale * jax.random.normal(next(ks), shape)).astype(jnp.bfloat16)

    def vec(shape, scale=0.02):    # biases stay f32 (added to f32 accumulators)
        return (scale * jax.random.normal(next(ks), shape)).astype(jnp.float32)

    params = {
        "tok_emb": (0.02 * jax.random.normal(next(ks), (vocab, title_emb_size))
                    ).astype(jnp.float32),
        "ttype_emb": (0.02 * jax.random.normal(next(ks), (ttype_len, title_emb_size))
                      ).astype(jnp.float32),
        "th_w": mat((title_emb_size, D)), "th_b": vec((1, D)),
        "tf_w": mat((title_emb_size, D)), "tf_b": vec((1, D)),
        "lg1_w": mat((D, hidden_size)), "lg1_b": vec((1, hidden_size)),
        "lg2_w": mat((hidden_size, apisets_emsize)), "lg2_b": vec((1, apisets_emsize)),
        "layers": [],
        "nhead": nhead,
    }
    for _ in range(num_layers):
        params["layers"].append({
            "in_proj_w": mat((D, 3 * D)), "in_proj_b": vec((1, 3 * D)),
            "out_w": mat((D, D)), "out_b": vec((1, D)),
            "ln1_g": jnp.ones((1, D), jnp.float32), "ln1_b": jnp.zeros((1, D), jnp.float32),
            "ff1_w": mat((D, dff)), "ff1_b": vec((1, dff)),
            "ff2_w": mat((dff, D)), "ff2_b": vec((1, D)),
            "ln2_g": jnp.ones((1, D), jnp.float32), "ln2_b": jnp.zeros((1, D), jnp.float32),
        })
    return params


# ------------------------------- forward pass --------------------------------

def _const_spec(arr):
    # Whole array resident in VMEM, same block for every grid step (weights/biases).
    nd = arr.ndim
    return pl.BlockSpec(arr.shape, lambda b, _nd=nd: (0,) * _nd)


def t2e_forward(params, title_ids, apis_type=None):
    B, S = title_ids.shape
    nhead = params["nhead"]
    use_type = apis_type is not None

    tok_emb = params["tok_emb"]
    Et = tok_emb.shape[-1]
    D = params["th_w"].shape[-1]
    H = params["lg1_w"].shape[-1]
    A = params["lg2_w"].shape[-1]
    A_pad = ((A + 127) // 128) * 128        # lane-dense output stores
    L = len(params["layers"])
    dff = params["layers"][0]["ff1_w"].shape[-1]
    Dh = D // nhead

    # Batch tile: ~256 matmul rows per grid step (near-full MXU sublane occupancy),
    # halved if that keeps >= 2 grid steps (v7x megacore) without dropping under 128 rows.
    tb = max(1, min(max(1, 256 // S), B))
    if pl.cdiv(B, tb) < 2 and (tb // 2) * S >= 128:
        tb = max(1, tb // 2)
    n_steps = pl.cdiv(B, tb)
    B_pad = n_steps * tb

    if B_pad != B:
        title_ids = jnp.pad(title_ids, ((0, B_pad - B), (0, 0)))
        if use_type:
            apis_type = jnp.pad(apis_type.reshape(B), (0, B_pad - B))

    # TODO(synk): fuse the embedding gather into the kernel (in-kernel DMA gather);
    # kept as jnp.take glue for now — latency-only cost that grows with batch.
    emb = jnp.take(tok_emb, title_ids.reshape(-1), axis=0).astype(jnp.bfloat16)
    emb = emb.reshape(B_pad, S, Et)

    args = [emb]
    specs = [pl.BlockSpec((tb, S, Et), lambda b: (b, 0, 0))]

    if use_type:
        temb = jnp.take(params["ttype_emb"], apis_type.reshape(B_pad), axis=0)
        temb = temb.astype(jnp.bfloat16).reshape(B_pad, 1, Et)
        args.append(temb)
        specs.append(pl.BlockSpec((tb, 1, Et), lambda b: (b, 0, 0)))

    def add_w(*arrs):
        for a in arrs:
            args.append(a)
            specs.append(_const_spec(a))

    add_w(params["th_w"], params["th_b"])
    if use_type:
        add_w(params["tf_w"], params["tf_b"])
    for layer in params["layers"]:
        add_w(*(layer[k] for k in _LAYER_KEYS))

    lg2_w, lg2_b = params["lg2_w"], params["lg2_b"]
    if A_pad != A:                           # zero-pad logits head to 128-lane multiple
        lg2_w = jnp.pad(lg2_w, ((0, 0), (0, A_pad - A)))
        lg2_b = jnp.pad(lg2_b, ((0, 0), (0, A_pad - A)))
    add_w(params["lg1_w"], params["lg1_b"], lg2_w, lg2_b)

    kernel = functools.partial(
        _t2e_fused_kernel, tb=tb, seq=S, nhead=nhead,
        num_layers=L, use_type=use_type)

    # Advisory cost estimate so XLA overlaps the surrounding gather/pad glue.
    rows = B_pad * S
    flops = 2 * rows * Et * D
    if use_type:
        flops += 2 * B_pad * Et * D
    flops += L * (2 * rows * D * 3 * D          # qkv projection
                  + 4 * B_pad * nhead * S * S * Dh   # scores + p@v
                  + 2 * rows * D * D            # out projection
                  + 4 * rows * D * dff)         # FFN
    flops += 2 * rows * D * H + 2 * rows * H * A_pad
    transcendentals = L * (nhead * B_pad * S * S + 2 * rows)
    n_act = 1 + int(use_type)
    w_bytes = sum(int(a.nbytes) for a in args[n_act:])
    bytes_accessed = (int(emb.nbytes)
                      + (int(args[1].nbytes) if use_type else 0)
                      + w_bytes + rows * A_pad * 4)

    out = pl.pallas_call(
        kernel,
        out_shape=jax.ShapeDtypeStruct((B_pad, S, A_pad), jnp.float32),
        grid=(n_steps,),
        in_specs=specs,
        out_specs=pl.BlockSpec((tb, S, A_pad), lambda b: (b, 0, 0)),
        compiler_params=pltpu.CompilerParams(
            dimension_semantics=("parallel",)),   # lets v7x split grid steps across TCs
        cost_estimate=pl.CostEstimate(flops=int(flops),
                                      transcendentals=int(transcendentals),
                                      bytes_accessed=int(bytes_accessed)),
    )(*args)
    return out[:B, :, :A]


# ----------------------------------- main -------------------------------------

if __name__ == "__main__":
    # small, module-consistent shapes
    batch = 2
    seq_len = 8
    vocab = 50
    title_emb_size = 32
    hidden_size = 32           # -> d_model = 64, dim_feedforward = 32
    apisets_emsize = 24
    ttype_len = 6

    key = jax.random.PRNGKey(0)
    pkey, ikey, tkey = jax.random.split(key, 3)

    params = init_params(
        pkey, vocab=vocab, title_emb_size=title_emb_size, hidden_size=hidden_size,
        apisets_emsize=apisets_emsize, ttype_len=ttype_len)

    title_ids = jax.random.randint(ikey, (batch, seq_len), 0, vocab, dtype=jnp.int32)
    apis_type = jax.random.randint(tkey, (batch, 1), 0, ttype_len, dtype=jnp.int32)

    out = t2e_forward(params, title_ids, apis_type)
    jax.block_until_ready(out)
    assert out.shape == (batch, seq_len, apisets_emsize)
    assert out.dtype == jnp.float32
    print("KERNEL_OK")
</pallas_src>

<mosaic_0001>
module attributes {stable_mosaic.version = 11 : i64} {
  func.func @_t2e_fused_kernel(%arg0: i32, %arg1: memref<2x8x32xbf16, #tpu.memory_space<vmem>>, %arg2: memref<2x1x32xbf16, #tpu.memory_space<vmem>>, %arg3: memref<32x64xbf16, #tpu.memory_space<vmem>>, %arg4: memref<1x64xf32, #tpu.memory_space<vmem>>, %arg5: memref<32x64xbf16, #tpu.memory_space<vmem>>, %arg6: memref<1x64xf32, #tpu.memory_space<vmem>>, %arg7: memref<64x192xbf16, #tpu.memory_space<vmem>>, %arg8: memref<1x192xf32, #tpu.memory_space<vmem>>, %arg9: memref<64x64xbf16, #tpu.memory_space<vmem>>, %arg10: memref<1x64xf32, #tpu.memory_space<vmem>>, %arg11: memref<1x64xf32, #tpu.memory_space<vmem>>, %arg12: memref<1x64xf32, #tpu.memory_space<vmem>>, %arg13: memref<64x32xbf16, #tpu.memory_space<vmem>>, %arg14: memref<1x32xf32, #tpu.memory_space<vmem>>, %arg15: memref<32x64xbf16, #tpu.memory_space<vmem>>, %arg16: memref<1x64xf32, #tpu.memory_space<vmem>>, %arg17: memref<1x64xf32, #tpu.memory_space<vmem>>, %arg18: memref<1x64xf32, #tpu.memory_space<vmem>>, %arg19: memref<64x192xbf16, #tpu.memory_space<vmem>>, %arg20: memref<1x192xf32, #tpu.memory_space<vmem>>, %arg21: memref<64x64xbf16, #tpu.memory_space<vmem>>, %arg22: memref<1x64xf32, #tpu.memory_space<vmem>>, %arg23: memref<1x64xf32, #tpu.memory_space<vmem>>, %arg24: memref<1x64xf32, #tpu.memory_space<vmem>>, %arg25: memref<64x32xbf16, #tpu.memory_space<vmem>>, %arg26: memref<1x32xf32, #tpu.memory_space<vmem>>, %arg27: memref<32x64xbf16, #tpu.memory_space<vmem>>, %arg28: memref<1x64xf32, #tpu.memory_space<vmem>>, %arg29: memref<1x64xf32, #tpu.memory_space<vmem>>, %arg30: memref<1x64xf32, #tpu.memory_space<vmem>>, %arg31: memref<64x32xbf16, #tpu.memory_space<vmem>>, %arg32: memref<1x32xf32, #tpu.memory_space<vmem>>, %arg33: memref<32x128xbf16, #tpu.memory_space<vmem>>, %arg34: memref<1x128xf32, #tpu.memory_space<vmem>>, %arg35: memref<2x8x128xf32, #tpu.memory_space<vmem>>) attributes {dimension_semantics = [#tpu.dimension_semantics<parallel>], iteration_bounds = array<i64: 1>, scalar_prefetch = 0 : i64, scratch_operands = 0 : i64, tpu.core_type = #tpu.core_type<tc>, window_params = [{transform_indices = @transform_0, window_bounds = array<i64: 2, 8, 32>}, {transform_indices = @transform_1, window_bounds = array<i64: 2, 1, 32>}, {pipeline_mode = #tpu.pipeline_mode<synchronous>, transform_indices = @transform_2, window_bounds = array<i64: 32, 64>}, {pipeline_mode = #tpu.pipeline_mode<synchronous>, transform_indices = @transform_3, window_bounds = array<i64: 1, 64>}, {pipeline_mode = #tpu.pipeline_mode<synchronous>, transform_indices = @transform_4, window_bounds = array<i64: 32, 64>}, {pipeline_mode = #tpu.pipeline_mode<synchronous>, transform_indices = @transform_5, window_bounds = array<i64: 1, 64>}, {pipeline_mode = #tpu.pipeline_mode<synchronous>, transform_indices = @transform_6, window_bounds = array<i64: 64, 192>}, {pipeline_mode = #tpu.pipeline_mode<synchronous>, transform_indices = @transform_7, window_bounds = array<i64: 1, 192>}, {pipeline_mode = #tpu.pipeline_mode<synchronous>, transform_indices = @transform_8, window_bounds = array<i64: 64, 64>}, {pipeline_mode = #tpu.pipeline_mode<synchronous>, transform_indices = @transform_9, window_bounds = array<i64: 1, 64>}, {pipeline_mode = #tpu.pipeline_mode<synchronous>, transform_indices = @transform_10, window_bounds = array<i64: 1, 64>}, {pipeline_mode = #tpu.pipeline_mode<synchronous>, transform_indices = @transform_11, window_bounds = array<i64: 1, 64>}, {pipeline_mode = #tpu.pipeline_mode<synchronous>, transform_indices = @transform_12, window_bounds = array<i64: 64, 32>}, {pipeline_mode = #tpu.pipeline_mode<synchronous>, transform_indices = @transform_13, window_bounds = array<i64: 1, 32>}, {pipeline_mode = #tpu.pipeline_mode<synchronous>, transform_indices = @transform_14, window_bounds = array<i64: 32, 64>}, {pipeline_mode = #tpu.pipeline_mode<synchronous>, transform_indices = @transform_15, window_bounds = array<i64: 1, 64>}, {pipeline_mode = #tpu.pipeline_mode<synchronous>, transform_indices = @transform_16, window_bounds = array<i64: 1, 64>}, {pipeline_mode = #tpu.pipeline_mode<synchronous>, transform_indices = @transform_17, window_bounds = array<i64: 1, 64>}, {pipeline_mode = #tpu.pipeline_mode<synchronous>, transform_indices = @transform_18, window_bounds = array<i64: 64, 192>}, {pipeline_mode = #tpu.pipeline_mode<synchronous>, transform_indices = @transform_19, window_bounds = array<i64: 1, 192>}, {pipeline_mode = #tpu.pipeline_mode<synchronous>, transform_indices = @transform_20, window_bounds = array<i64: 64, 64>}, {pipeline_mode = #tpu.pipeline_mode<synchronous>, transform_indices = @transform_21, window_bounds = array<i64: 1, 64>}, {pipeline_mode = #tpu.pipeline_mode<synchronous>, transform_indices = @transform_22, window_bounds = array<i64: 1, 64>}, {pipeline_mode = #tpu.pipeline_mode<synchronous>, transform_indices = @transform_23, window_bounds = array<i64: 1, 64>}, {pipeline_mode = #tpu.pipeline_mode<synchronous>, transform_indices = @transform_24, window_bounds = array<i64: 64, 32>}, {pipeline_mode = #tpu.pipeline_mode<synchronous>, transform_indices = @transform_25, window_bounds = array<i64: 1, 32>}, {pipeline_mode = #tpu.pipeline_mode<synchronous>, transform_indices = @transform_26, window_bounds = array<i64: 32, 64>}, {pipeline_mode = #tpu.pipeline_mode<synchronous>, transform_indices = @transform_27, window_bounds = array<i64: 1, 64>}, {pipeline_mode = #tpu.pipeline_mode<synchronous>, transform_indices = @transform_28, window_bounds = array<i64: 1, 64>}, {pipeline_mode = #tpu.pipeline_mode<synchronous>, transform_indices = @transform_29, window_bounds = array<i64: 1, 64>}, {pipeline_mode = #tpu.pipeline_mode<synchronous>, transform_indices = @transform_30, window_bounds = array<i64: 64, 32>}, {pipeline_mode = #tpu.pipeline_mode<synchronous>, transform_indices = @transform_31, window_bounds = array<i64: 1, 32>}, {pipeline_mode = #tpu.pipeline_mode<synchronous>, transform_indices = @transform_32, window_bounds = array<i64: 32, 128>}, {pipeline_mode = #tpu.pipeline_mode<synchronous>, transform_indices = @transform_33, window_bounds = array<i64: 1, 128>}, {transform_indices = @transform_34, window_bounds = array<i64: 2, 8, 128>}]} {
    %c0 = arith.constant 0 : index
    %c0_0 = arith.constant 0 : index
    %c0_1 = arith.constant 0 : index
    %0 = vector.load %arg1[%c0, %c0_0, %c0_1] : memref<2x8x32xbf16, #tpu.memory_space<vmem>>, vector<2x8x32xbf16>
    %1 = vector.shape_cast %0 : vector<2x8x32xbf16> to vector<16x32xbf16>
    %c0_2 = arith.constant 0 : index
    %c0_3 = arith.constant 0 : index
    %2 = vector.load %arg3[%c0_2, %c0_3] : memref<32x64xbf16, #tpu.memory_space<vmem>>, vector<32x64xbf16>
    %cst = arith.constant dense<0.000000e+00> : vector<16x64xf32>
    %3 = tpu.matmul %1, %2, %cst {dimension_numbers = #tpu.dot_dimension_numbers<[1], [0], [0], [1], [0, 0, 1, 1], [], []>} : vector<16x32xbf16>, vector<32x64xbf16>, vector<16x64xf32> -> vector<16x64xf32>
    %c0_4 = arith.constant 0 : index
    %c0_5 = arith.constant 0 : index
    %4 = vector.load %arg4[%c0_4, %c0_5] : memref<1x64xf32, #tpu.memory_space<vmem>>, vector<1x64xf32>
    %5 = vector.broadcast %4 : vector<1x64xf32> to vector<16x64xf32>
    %6 = arith.addf %3, %5 : vector<16x64xf32>
    %c0_6 = arith.constant 0 : index
    %c0_7 = arith.constant 0 : index
    %c0_8 = arith.constant 0 : index
    %7 = vector.load %arg2[%c0_6, %c0_7, %c0_8] : memref<2x1x32xbf16, #tpu.memory_space<vmem>>, vector<2x1x32xbf16>
    %8 = vector.shape_cast %7 : vector<2x1x32xbf16> to vector<2x32xbf16>
    %c0_9 = arith.constant 0 : index
    %c0_10 = arith.constant 0 : index
    %9 = vector.load %arg5[%c0_9, %c0_10] : memref<32x64xbf16, #tpu.memory_space<vmem>>, vector<32x64xbf16>
    %cst_11 = arith.constant dense<0.000000e+00> : vector<2x64xf32>
    %10 = tpu.matmul %8, %9, %cst_11 {dimension_numbers = #tpu.dot_dimension_numbers<[1], [0], [0], [1], [0, 0, 1, 1], [], []>} : vector<2x32xbf16>, vector<32x64xbf16>, vector<2x64xf32> -> vector<2x64xf32>
    %c0_12 = arith.constant 0 : index
    %c0_13 = arith.constant 0 : index
    %11 = vector.load %arg6[%c0_12, %c0_13] : memref<1x64xf32, #tpu.memory_space<vmem>>, vector<1x64xf32>
    %12 = vector.broadcast %11 : vector<1x64xf32> to vector<2x64xf32>
    %13 = arith.addf %10, %12 : vector<2x64xf32>
    %14 = vector.shape_cast %6 : vector<16x64xf32> to vector<2x8x64xf32>
    %15 = vector.shape_cast %13 : vector<2x64xf32> to vector<2x1x64xf32>
    %16 = vector.broadcast %15 : vector<2x1x64xf32> to vector<2x8x64xf32>
    %17 = arith.addf %14, %16 : vector<2x8x64xf32>
    %18 = vector.shape_cast %17 : vector<2x8x64xf32> to vector<16x64xf32>
    %19 = arith.truncf %18 : vector<16x64xf32> to vector<16x64xbf16>
    %c0_14 = arith.constant 0 : index
    %c0_15 = arith.constant 0 : index
    %20 = vector.load %arg7[%c0_14, %c0_15] : memref<64x192xbf16, #tpu.memory_space<vmem>>, vector<64x192xbf16>
    %cst_16 = arith.constant dense<0.000000e+00> : vector<16x192xf32>
    %21 = tpu.matmul %19, %20, %cst_16 {dimension_numbers = #tpu.dot_dimension_numbers<[1], [0], [0], [1], [0, 0, 1, 1], [], []>} : vector<16x64xbf16>, vector<64x192xbf16>, vector<16x192xf32> -> vector<16x192xf32>
    %c0_17 = arith.constant 0 : index
    %c0_18 = arith.constant 0 : index
    %22 = vector.load %arg8[%c0_17, %c0_18] : memref<1x192xf32, #tpu.memory_space<vmem>>, vector<1x192xf32>
    %23 = vector.broadcast %22 : vector<1x192xf32> to vector<16x192xf32>
    %24 = arith.addf %21, %23 : vector<16x192xf32>
    %25 = vector.extract_strided_slice %24 {offsets = [0, 0], sizes = [16, 32], strides = [1, 1]} : vector<16x192xf32> to vector<16x32xf32>
    %26 = vector.shape_cast %25 : vector<16x32xf32> to vector<2x8x32xf32>
    %27 = arith.truncf %26 : vector<2x8x32xf32> to vector<2x8x32xbf16>
    %28 = vector.extract_strided_slice %24 {offsets = [0, 64], sizes = [16, 32], strides = [1, 1]} : vector<16x192xf32> to vector<16x32xf32>
    %29 = vector.shape_cast %28 : vector<16x32xf32> to vector<2x8x32xf32>
    %30 = arith.truncf %29 : vector<2x8x32xf32> to vector<2x8x32xbf16>
    %31 = vector.extract_strided_slice %24 {offsets = [0, 128], sizes = [16, 32], strides = [1, 1]} : vector<16x192xf32> to vector<16x32xf32>
    %32 = vector.shape_cast %31 : vector<16x32xf32> to vector<2x8x32xf32>
    %33 = arith.truncf %32 : vector<2x8x32xf32> to vector<2x8x32xbf16>
    %cst_19 = arith.constant dense<0.000000e+00> : vector<2x8x8xf32>
    %34 = tpu.matmul %27, %30, %cst_19 {dimension_numbers = #tpu.dot_dimension_numbers<[2], [2], [1], [1], [0, 0, 0, 1, 1, 1], [0], [0]>} : vector<2x8x32xbf16>, vector<2x8x32xbf16>, vector<2x8x8xf32> -> vector<2x8x8xf32>
    %cst_20 = arith.constant 0.176776692 : f32
    %35 = vector.broadcast %cst_20 : f32 to vector<2x8x8xf32>
    %36 = arith.mulf %34, %35 : vector<2x8x8xf32>
    %cst_21 = arith.constant dense<0xFF800000> : vector<2x8xf32>
    %37 = vector.multi_reduction <maximumf>, %36, %cst_21 [2] : vector<2x8x8xf32> to vector<2x8xf32>
    %38 = vector.shape_cast %37 : vector<2x8xf32> to vector<2x8x1xf32>
    %39 = vector.broadcast %38 : vector<2x8x1xf32> to vector<2x8x8xf32>
    %40 = arith.subf %36, %39 : vector<2x8x8xf32>
    %41 = math.exp %40 : vector<2x8x8xf32>
    %cst_22 = arith.constant dense<0.000000e+00> : vector<2x8xf32>
    %42 = vector.multi_reduction <add>, %41, %cst_22 [2] : vector<2x8x8xf32> to vector<2x8xf32>
    %43 = vector.shape_cast %42 : vector<2x8xf32> to vector<2x8x1xf32>
    %44 = tpu.reciprocal %43 {approx = true} : vector<2x8x1xf32> -> vector<2x8x1xf32>
    %45 = vector.broadcast %44 : vector<2x8x1xf32> to vector<2x8x8xf32>
    %46 = arith.mulf %41, %45 : vector<2x8x8xf32>
    %47 = arith.truncf %46 : vector<2x8x8xf32> to vector<2x8x8xbf16>
    %cst_23 = arith.constant dense<0.000000e+00> : vector<2x8x32xf32>
    %48 = tpu.matmul %47, %33, %cst_23 {dimension_numbers = #tpu.dot_dimension_numbers<[2], [1], [1], [2], [0, 0, 0, 1, 1, 2], [0], [0]>} : vector<2x8x8xbf16>, vector<2x8x32xbf16>, vector<2x8x32xf32> -> vector<2x8x32xf32>
    %49 = vector.shape_cast %48 : vector<2x8x32xf32> to vector<16x32xf32>
    %50 = vector.extract_strided_slice %24 {offsets = [0, 32], sizes = [16, 32], strides = [1, 1]} : vector<16x192xf32> to vector<16x32xf32>
    %51 = vector.shape_cast %50 : vector<16x32xf32> to vector<2x8x32xf32>
    %52 = arith.truncf %51 : vector<2x8x32xf32> to vector<2x8x32xbf16>
    %53 = vector.extract_strided_slice %24 {offsets = [0, 96], sizes = [16, 32], strides = [1, 1]} : vector<16x192xf32> to vector<16x32xf32>
    %54 = vector.shape_cast %53 : vector<16x32xf32> to vector<2x8x32xf32>
    %55 = arith.truncf %54 : vector<2x8x32xf32> to vector<2x8x32xbf16>
    %56 = vector.extract_strided_slice %24 {offsets = [0, 160], sizes = [16, 32], strides = [1, 1]} : vector<16x192xf32> to vector<16x32xf32>
    %57 = vector.shape_cast %56 : vector<16x32xf32> to vector<2x8x32xf32>
    %58 = arith.truncf %57 : vector<2x8x32xf32> to vector<2x8x32xbf16>
    %cst_24 = arith.constant dense<0.000000e+00> : vector<2x8x8xf32>
    %59 = tpu.matmul %52, %55, %cst_24 {dimension_numbers = #tpu.dot_dimension_numbers<[2], [2], [1], [1], [0, 0, 0, 1, 1, 1], [0], [0]>} : vector<2x8x32xbf16>, vector<2x8x32xbf16>, vector<2x8x8xf32> -> vector<2x8x8xf32>
    %cst_25 = arith.constant 0.176776692 : f32
    %60 = vector.broadcast %cst_25 : f32 to vector<2x8x8xf32>
    %61 = arith.mulf %59, %60 : vector<2x8x8xf32>
    %cst_26 = arith.constant dense<0xFF800000> : vector<2x8xf32>
    %62 = vector.multi_reduction <maximumf>, %61, %cst_26 [2] : vector<2x8x8xf32> to vector<2x8xf32>
    %63 = vector.shape_cast %62 : vector<2x8xf32> to vector<2x8x1xf32>
    %64 = vector.broadcast %63 : vector<2x8x1xf32> to vector<2x8x8xf32>
    %65 = arith.subf %61, %64 : vector<2x8x8xf32>
    %66 = math.exp %65 : vector<2x8x8xf32>
    %cst_27 = arith.constant dense<0.000000e+00> : vector<2x8xf32>
    %67 = vector.multi_reduction <add>, %66, %cst_27 [2] : vector<2x8x8xf32> to vector<2x8xf32>
    %68 = vector.shape_cast %67 : vector<2x8xf32> to vector<2x8x1xf32>
    %69 = tpu.reciprocal %68 {approx = true} : vector<2x8x1xf32> -> vector<2x8x1xf32>
    %70 = vector.broadcast %69 : vector<2x8x1xf32> to vector<2x8x8xf32>
    %71 = arith.mulf %66, %70 : vector<2x8x8xf32>
    %72 = arith.truncf %71 : vector<2x8x8xf32> to vector<2x8x8xbf16>
    %cst_28 = arith.constant dense<0.000000e+00> : vector<2x8x32xf32>
    %73 = tpu.matmul %72, %58, %cst_28 {dimension_numbers = #tpu.dot_dimension_numbers<[2], [1], [1], [2], [0, 0, 0, 1, 1, 2], [0], [0]>} : vector<2x8x8xbf16>, vector<2x8x32xbf16>, vector<2x8x32xf32> -> vector<2x8x32xf32>
    %74 = vector.shape_cast %73 : vector<2x8x32xf32> to vector<16x32xf32>
    %75 = tpu.concatenate %49, %74 in 1 : vector<16x32xf32>, vector<16x32xf32> -> vector<16x64xf32>
    %76 = arith.truncf %75 : vector<16x64xf32> to vector<16x64xbf16>
    %c0_29 = arith.constant 0 : index
    %c0_30 = arith.constant 0 : index
    %77 = vector.load %arg9[%c0_29, %c0_30] : memref<64x64xbf16, #tpu.memory_space<vmem>>, vector<64x64xbf16>
    %cst_31 = arith.constant dense<0.000000e+00> : vector<16x64xf32>
    %78 = tpu.matmul %76, %77, %cst_31 {dimension_numbers = #tpu.dot_dimension_numbers<[1], [0], [0], [1], [0, 0, 1, 1], [], []>} : vector<16x64xbf16>, vector<64x64xbf16>, vector<16x64xf32> -> vector<16x64xf32>
    %c0_32 = arith.constant 0 : index
    %c0_33 = arith.constant 0 : index
    %79 = vector.load %arg10[%c0_32, %c0_33] : memref<1x64xf32, #tpu.memory_space<vmem>>, vector<1x64xf32>
    %80 = vector.broadcast %79 : vector<1x64xf32> to vector<16x64xf32>
    %81 = arith.addf %78, %80 : vector<16x64xf32>
    %c0_34 = arith.constant 0 : index
    %c0_35 = arith.constant 0 : index
    %82 = vector.load %arg11[%c0_34, %c0_35] : memref<1x64xf32, #tpu.memory_space<vmem>>, vector<1x64xf32>
    %c0_36 = arith.constant 0 : index
    %c0_37 = arith.constant 0 : index
    %83 = vector.load %arg12[%c0_36, %c0_37] : memref<1x64xf32, #tpu.memory_space<vmem>>, vector<1x64xf32>
    %84 = arith.addf %18, %81 : vector<16x64xf32>
    %cst_38 = arith.constant dense<0.000000e+00> : vector<16xf32>
    %85 = vector.multi_reduction <add>, %84, %cst_38 [1] : vector<16x64xf32> to vector<16xf32>
    %86 = vector.shape_cast %85 : vector<16xf32> to vector<16x1xf32>
    %cst_39 = arith.constant 6.400000e+01 : f32
    %87 = vector.broadcast %cst_39 : f32 to vector<16x1xf32>
    %88 = arith.divf %86, %87 : vector<16x1xf32>
    %89 = vector.broadcast %88 : vector<16x1xf32> to vector<16x64xf32>
    %90 = arith.subf %84, %89 : vector<16x64xf32>
    %91 = arith.mulf %90, %90 : vector<16x64xf32>
    %cst_40 = arith.constant dense<0.000000e+00> : vector<16xf32>
    %92 = vector.multi_reduction <add>, %91, %cst_40 [1] : vector<16x64xf32> to vector<16xf32>
    %93 = vector.shape_cast %92 : vector<16xf32> to vector<16x1xf32>
    %cst_41 = arith.constant 6.400000e+01 : f32
    %94 = vector.broadcast %cst_41 : f32 to vector<16x1xf32>
    %95 = arith.divf %93, %94 : vector<16x1xf32>
    %96 = vector.broadcast %88 : vector<16x1xf32> to vector<16x64xf32>
    %97 = arith.subf %84, %96 : vector<16x64xf32>
    %cst_42 = arith.constant 9.99999974E-6 : f32
    %98 = vector.broadcast %cst_42 : f32 to vector<16x1xf32>
    %99 = arith.addf %95, %98 : vector<16x1xf32>
    %100 = math.rsqrt %99 : vector<16x1xf32>
    %101 = vector.broadcast %100 : vector<16x1xf32> to vector<16x64xf32>
    %102 = arith.mulf %97, %101 : vector<16x64xf32>
    %103 = vector.broadcast %82 : vector<1x64xf32> to vector<16x64xf32>
    %104 = arith.mulf %102, %103 : vector<16x64xf32>
    %105 = vector.broadcast %83 : vector<1x64xf32> to vector<16x64xf32>
    %106 = arith.addf %104, %105 : vector<16x64xf32>
    %107 = arith.truncf %106 : vector<16x64xf32> to vector<16x64xbf16>
    %c0_43 = arith.constant 0 : index
    %c0_44 = arith.constant 0 : index
    %108 = vector.load %arg13[%c0_43, %c0_44] : memref<64x32xbf16, #tpu.memory_space<vmem>>, vector<64x32xbf16>
    %cst_45 = arith.constant dense<0.000000e+00> : vector<16x32xf32>
    %109 = tpu.matmul %107, %108, %cst_45 {dimension_numbers = #tpu.dot_dimension_numbers<[1], [0], [0], [1], [0, 0, 1, 1], [], []>} : vector<16x64xbf16>, vector<64x32xbf16>, vector<16x32xf32> -> vector<16x32xf32>
    %c0_46 = arith.constant 0 : index
    %c0_47 = arith.constant 0 : index
    %110 = vector.load %arg14[%c0_46, %c0_47] : memref<1x32xf32, #tpu.memory_space<vmem>>, vector<1x32xf32>
    %111 = vector.broadcast %110 : vector<1x32xf32> to vector<16x32xf32>
    %112 = arith.addf %109, %111 : vector<16x32xf32>
    %cst_48 = arith.constant 0.000000e+00 : f32
    %113 = vector.broadcast %cst_48 : f32 to vector<16x32xf32>
    %114 = arith.maximumf %112, %113 : vector<16x32xf32>
    %115 = arith.truncf %114 : vector<16x32xf32> to vector<16x32xbf16>
    %c0_49 = arith.constant 0 : index
    %c0_50 = arith.constant 0 : index
    %116 = vector.load %arg15[%c0_49, %c0_50] : memref<32x64xbf16, #tpu.memory_space<vmem>>, vector<32x64xbf16>
    %cst_51 = arith.constant dense<0.000000e+00> : vector<16x64xf32>
    %117 = tpu.matmul %115, %116, %cst_51 {dimension_numbers = #tpu.dot_dimension_numbers<[1], [0], [0], [1], [0, 0, 1, 1], [], []>} : vector<16x32xbf16>, vector<32x64xbf16>, vector<16x64xf32> -> vector<16x64xf32>
    %c0_52 = arith.constant 0 : index
    %c0_53 = arith.constant 0 : index
    %118 = vector.load %arg16[%c0_52, %c0_53] : memref<1x64xf32, #tpu.memory_space<vmem>>, vector<1x64xf32>
    %119 = vector.broadcast %118 : vector<1x64xf32> to vector<16x64xf32>
    %120 = arith.addf %117, %119 : vector<16x64xf32>
    %c0_54 = arith.constant 0 : index
    %c0_55 = arith.constant 0 : index
    %121 = vector.load %arg17[%c0_54, %c0_55] : memref<1x64xf32, #tpu.memory_space<vmem>>, vector<1x64xf32>
    %c0_56 = arith.constant 0 : index
    %c0_57 = arith.constant 0 : index
    %122 = vector.load %arg18[%c0_56, %c0_57] : memref<1x64xf32, #tpu.memory_space<vmem>>, vector<1x64xf32>
    %123 = arith.addf %106, %120 : vector<16x64xf32>
    %cst_58 = arith.constant dense<0.000000e+00> : vector<16xf32>
    %124 = vector.multi_reduction <add>, %123, %cst_58 [1] : vector<16x64xf32> to vector<16xf32>
    %125 = vector.shape_cast %124 : vector<16xf32> to vector<16x1xf32>
    %cst_59 = arith.constant 6.400000e+01 : f32
    %126 = vector.broadcast %cst_59 : f32 to vector<16x1xf32>
    %127 = arith.divf %125, %126 : vector<16x1xf32>
    %128 = vector.broadcast %127 : vector<16x1xf32> to vector<16x64xf32>
    %129 = arith.subf %123, %128 : vector<16x64xf32>
    %130 = arith.mulf %129, %129 : vector<16x64xf32>
    %cst_60 = arith.constant dense<0.000000e+00> : vector<16xf32>
    %131 = vector.multi_reduction <add>, %130, %cst_60 [1] : vector<16x64xf32> to vector<16xf32>
    %132 = vector.shape_cast %131 : vector<16xf32> to vector<16x1xf32>
    %cst_61 = arith.constant 6.400000e+01 : f32
    %133 = vector.broadcast %cst_61 : f32 to vector<16x1xf32>
    %134 = arith.divf %132, %133 : vector<16x1xf32>
    %135 = vector.broadcast %127 : vector<16x1xf32> to vector<16x64xf32>
    %136 = arith.subf %123, %135 : vector<16x64xf32>
    %cst_62 = arith.constant 9.99999974E-6 : f32
    %137 = vector.broadcast %cst_62 : f32 to vector<16x1xf32>
    %138 = arith.addf %134, %137 : vector<16x1xf32>
    %139 = math.rsqrt %138 : vector<16x1xf32>
    %140 = vector.broadcast %139 : vector<16x1xf32> to vector<16x64xf32>
    %141 = arith.mulf %136, %140 : vector<16x64xf32>
    %142 = vector.broadcast %121 : vector<1x64xf32> to vector<16x64xf32>
    %143 = arith.mulf %141, %142 : vector<16x64xf32>
    %144 = vector.broadcast %122 : vector<1x64xf32> to vector<16x64xf32>
    %145 = arith.addf %143, %144 : vector<16x64xf32>
    %146 = arith.truncf %145 : vector<16x64xf32> to vector<16x64xbf16>
    %c0_63 = arith.constant 0 : index
    %c0_64 = arith.constant 0 : index
    %147 = vector.load %arg19[%c0_63, %c0_64] : memref<64x192xbf16, #tpu.memory_space<vmem>>, vector<64x192xbf16>
    %cst_65 = arith.constant dense<0.000000e+00> : vector<16x192xf32>
    %148 = tpu.matmul %146, %147, %cst_65 {dimension_numbers = #tpu.dot_dimension_numbers<[1], [0], [0], [1], [0, 0, 1, 1], [], []>} : vector<16x64xbf16>, vector<64x192xbf16>, vector<16x192xf32> -> vector<16x192xf32>
    %c0_66 = arith.constant 0 : index
    %c0_67 = arith.constant 0 : index
    %149 = vector.load %arg20[%c0_66, %c0_67] : memref<1x192xf32, #tpu.memory_space<vmem>>, vector<1x192xf32>
    %150 = vector.broadcast %149 : vector<1x192xf32> to vector<16x192xf32>
    %151 = arith.addf %148, %150 : vector<16x192xf32>
    %152 = vector.extract_strided_slice %151 {offsets = [0, 0], sizes = [16, 32], strides = [1, 1]} : vector<16x192xf32> to vector<16x32xf32>
    %153 = vector.shape_cast %152 : vector<16x32xf32> to vector<2x8x32xf32>
    %154 = arith.truncf %153 : vector<2x8x32xf32> to vector<2x8x32xbf16>
    %155 = vector.extract_strided_slice %151 {offsets = [0, 64], sizes = [16, 32], strides = [1, 1]} : vector<16x192xf32> to vector<16x32xf32>
    %156 = vector.shape_cast %155 : vector<16x32xf32> to vector<2x8x32xf32>
    %157 = arith.truncf %156 : vector<2x8x32xf32> to vector<2x8x32xbf16>
    %158 = vector.extract_strided_slice %151 {offsets = [0, 128], sizes = [16, 32], strides = [1, 1]} : vector<16x192xf32> to vector<16x32xf32>
    %159 = vector.shape_cast %158 : vector<16x32xf32> to vector<2x8x32xf32>
    %160 = arith.truncf %159 : vector<2x8x32xf32> to vector<2x8x32xbf16>
    %cst_68 = arith.constant dense<0.000000e+00> : vector<2x8x8xf32>
    %161 = tpu.matmul %154, %157, %cst_68 {dimension_numbers = #tpu.dot_dimension_numbers<[2], [2], [1], [1], [0, 0, 0, 1, 1, 1], [0], [0]>} : vector<2x8x32xbf16>, vector<2x8x32xbf16>, vector<2x8x8xf32> -> vector<2x8x8xf32>
    %cst_69 = arith.constant 0.176776692 : f32
    %162 = vector.broadcast %cst_69 : f32 to vector<2x8x8xf32>
    %163 = arith.mulf %161, %162 : vector<2x8x8xf32>
    %cst_70 = arith.constant dense<0xFF800000> : vector<2x8xf32>
    %164 = vector.multi_reduction <maximumf>, %163, %cst_70 [2] : vector<2x8x8xf32> to vector<2x8xf32>
    %165 = vector.shape_cast %164 : vector<2x8xf32> to vector<2x8x1xf32>
    %166 = vector.broadcast %165 : vector<2x8x1xf32> to vector<2x8x8xf32>
    %167 = arith.subf %163, %166 : vector<2x8x8xf32>
    %168 = math.exp %167 : vector<2x8x8xf32>
    %cst_71 = arith.constant dense<0.000000e+00> : vector<2x8xf32>
    %169 = vector.multi_reduction <add>, %168, %cst_71 [2] : vector<2x8x8xf32> to vector<2x8xf32>
    %170 = vector.shape_cast %169 : vector<2x8xf32> to vector<2x8x1xf32>
    %171 = tpu.reciprocal %170 {approx = true} : vector<2x8x1xf32> -> vector<2x8x1xf32>
    %172 = vector.broadcast %171 : vector<2x8x1xf32> to vector<2x8x8xf32>
    %173 = arith.mulf %168, %172 : vector<2x8x8xf32>
    %174 = arith.truncf %173 : vector<2x8x8xf32> to vector<2x8x8xbf16>
    %cst_72 = arith.constant dense<0.000000e+00> : vector<2x8x32xf32>
    %175 = tpu.matmul %174, %160, %cst_72 {dimension_numbers = #tpu.dot_dimension_numbers<[2], [1], [1], [2], [0, 0, 0, 1, 1, 2], [0], [0]>} : vector<2x8x8xbf16>, vector<2x8x32xbf16>, vector<2x8x32xf32> -> vector<2x8x32xf32>
    %176 = vector.shape_cast %175 : vector<2x8x32xf32> to vector<16x32xf32>
    %177 = vector.extract_strided_slice %151 {offsets = [0, 32], sizes = [16, 32], strides = [1, 1]} : vector<16x192xf32> to vector<16x32xf32>
    %178 = vector.shape_cast %177 : vector<16x32xf32> to vector<2x8x32xf32>
    %179 = arith.truncf %178 : vector<2x8x32xf32> to vector<2x8x32xbf16>
    %180 = vector.extract_strided_slice %151 {offsets = [0, 96], sizes = [16, 32], strides = [1, 1]} : vector<16x192xf32> to vector<16x32xf32>
    %181 = vector.shape_cast %180 : vector<16x32xf32> to vector<2x8x32xf32>
    %182 = arith.truncf %181 : vector<2x8x32xf32> to vector<2x8x32xbf16>
    %183 = vector.extract_strided_slice %151 {offsets = [0, 160], sizes = [16, 32], strides = [1, 1]} : vector<16x192xf32> to vector<16x32xf32>
    %184 = vector.shape_cast %183 : vector<16x32xf32> to vector<2x8x32xf32>
    %185 = arith.truncf %184 : vector<2x8x32xf32> to vector<2x8x32xbf16>
    %cst_73 = arith.constant dense<0.000000e+00> : vector<2x8x8xf32>
    %186 = tpu.matmul %179, %182, %cst_73 {dimension_numbers = #tpu.dot_dimension_numbers<[2], [2], [1], [1], [0, 0, 0, 1, 1, 1], [0], [0]>} : vector<2x8x32xbf16>, vector<2x8x32xbf16>, vector<2x8x8xf32> -> vector<2x8x8xf32>
    %cst_74 = arith.constant 0.176776692 : f32
    %187 = vector.broadcast %cst_74 : f32 to vector<2x8x8xf32>
    %188 = arith.mulf %186, %187 : vector<2x8x8xf32>
    %cst_75 = arith.constant dense<0xFF800000> : vector<2x8xf32>
    %189 = vector.multi_reduction <maximumf>, %188, %cst_75 [2] : vector<2x8x8xf32> to vector<2x8xf32>
    %190 = vector.shape_cast %189 : vector<2x8xf32> to vector<2x8x1xf32>
    %191 = vector.broadcast %190 : vector<2x8x1xf32> to vector<2x8x8xf32>
    %192 = arith.subf %188, %191 : vector<2x8x8xf32>
    %193 = math.exp %192 : vector<2x8x8xf32>
    %cst_76 = arith.constant dense<0.000000e+00> : vector<2x8xf32>
    %194 = vector.multi_reduction <add>, %193, %cst_76 [2] : vector<2x8x8xf32> to vector<2x8xf32>
    %195 = vector.shape_cast %194 : vector<2x8xf32> to vector<2x8x1xf32>
    %196 = tpu.reciprocal %195 {approx = true} : vector<2x8x1xf32> -> vector<2x8x1xf32>
    %197 = vector.broadcast %196 : vector<2x8x1xf32> to vector<2x8x8xf32>
    %198 = arith.mulf %193, %197 : vector<2x8x8xf32>
    %199 = arith.truncf %198 : vector<2x8x8xf32> to vector<2x8x8xbf16>
    %cst_77 = arith.constant dense<0.000000e+00> : vector<2x8x32xf32>
    %200 = tpu.matmul %199, %185, %cst_77 {dimension_numbers = #tpu.dot_dimension_numbers<[2], [1], [1], [2], [0, 0, 0, 1, 1, 2], [0], [0]>} : vector<2x8x8xbf16>, vector<2x8x32xbf16>, vector<2x8x32xf32> -> vector<2x8x32xf32>
    %201 = vector.shape_cast %200 : vector<2x8x32xf32> to vector<16x32xf32>
    %202 = tpu.concatenate %176, %201 in 1 : vector<16x32xf32>, vector<16x32xf32> -> vector<16x64xf32>
    %203 = arith.truncf %202 : vector<16x64xf32> to vector<16x64xbf16>
    %c0_78 = arith.constant 0 : index
    %c0_79 = arith.constant 0 : index
    %204 = vector.load %arg21[%c0_78, %c0_79] : memref<64x64xbf16, #tpu.memory_space<vmem>>, vector<64x64xbf16>
    %cst_80 = arith.constant dense<0.000000e+00> : vector<16x64xf32>
    %205 = tpu.matmul %203, %204, %cst_80 {dimension_numbers = #tpu.dot_dimension_numbers<[1], [0], [0], [1], [0, 0, 1, 1], [], []>} : vector<16x64xbf16>, vector<64x64xbf16>, vector<16x64xf32> -> vector<16x64xf32>
    %c0_81 = arith.constant 0 : index
    %c0_82 = arith.constant 0 : index
    %206 = vector.load %arg22[%c0_81, %c0_82] : memref<1x64xf32, #tpu.memory_space<vmem>>, vector<1x64xf32>
    %207 = vector.broadcast %206 : vector<1x64xf32> to vector<16x64xf32>
    %208 = arith.addf %205, %207 : vector<16x64xf32>
    %c0_83 = arith.constant 0 : index
    %c0_84 = arith.constant 0 : index
    %209 = vector.load %arg23[%c0_83, %c0_84] : memref<1x64xf32, #tpu.memory_space<vmem>>, vector<1x64xf32>
    %c0_85 = arith.constant 0 : index
    %c0_86 = arith.constant 0 : index
    %210 = vector.load %arg24[%c0_85, %c0_86] : memref<1x64xf32, #tpu.memory_space<vmem>>, vector<1x64xf32>
    %211 = arith.addf %145, %208 : vector<16x64xf32>
    %cst_87 = arith.constant dense<0.000000e+00> : vector<16xf32>
    %212 = vector.multi_reduction <add>, %211, %cst_87 [1] : vector<16x64xf32> to vector<16xf32>
    %213 = vector.shape_cast %212 : vector<16xf32> to vector<16x1xf32>
    %cst_88 = arith.constant 6.400000e+01 : f32
    %214 = vector.broadcast %cst_88 : f32 to vector<16x1xf32>
    %215 = arith.divf %213, %214 : vector<16x1xf32>
    %216 = vector.broadcast %215 : vector<16x1xf32> to vector<16x64xf32>
    %217 = arith.subf %211, %216 : vector<16x64xf32>
    %218 = arith.mulf %217, %217 : vector<16x64xf32>
    %cst_89 = arith.constant dense<0.000000e+00> : vector<16xf32>
    %219 = vector.multi_reduction <add>, %218, %cst_89 [1] : vector<16x64xf32> to vector<16xf32>
    %220 = vector.shape_cast %219 : vector<16xf32> to vector<16x1xf32>
    %cst_90 = arith.constant 6.400000e+01 : f32
    %221 = vector.broadcast %cst_90 : f32 to vector<16x1xf32>
    %222 = arith.divf %220, %221 : vector<16x1xf32>
    %223 = vector.broadcast %215 : vector<16x1xf32> to vector<16x64xf32>
    %224 = arith.subf %211, %223 : vector<16x64xf32>
    %cst_91 = arith.constant 9.99999974E-6 : f32
    %225 = vector.broadcast %cst_91 : f32 to vector<16x1xf32>
    %226 = arith.addf %222, %225 : vector<16x1xf32>
    %227 = math.rsqrt %226 : vector<16x1xf32>
    %228 = vector.broadcast %227 : vector<16x1xf32> to vector<16x64xf32>
    %229 = arith.mulf %224, %228 : vector<16x64xf32>
    %230 = vector.broadcast %209 : vector<1x64xf32> to vector<16x64xf32>
    %231 = arith.mulf %229, %230 : vector<16x64xf32>
    %232 = vector.broadcast %210 : vector<1x64xf32> to vector<16x64xf32>
    %233 = arith.addf %231, %232 : vector<16x64xf32>
    %234 = arith.truncf %233 : vector<16x64xf32> to vector<16x64xbf16>
    %c0_92 = arith.constant 0 : index
    %c0_93 = arith.constant 0 : index
    %235 = vector.load %arg25[%c0_92, %c0_93] : memref<64x32xbf16, #tpu.memory_space<vmem>>, vector<64x32xbf16>
    %cst_94 = arith.constant dense<0.000000e+00> : vector<16x32xf32>
    %236 = tpu.matmul %234, %235, %cst_94 {dimension_numbers = #tpu.dot_dimension_numbers<[1], [0], [0], [1], [0, 0, 1, 1], [], []>} : vector<16x64xbf16>, vector<64x32xbf16>, vector<16x32xf32> -> vector<16x32xf32>
    %c0_95 = arith.constant 0 : index
    %c0_96 = arith.constant 0 : index
    %237 = vector.load %arg26[%c0_95, %c0_96] : memref<1x32xf32, #tpu.memory_space<vmem>>, vector<1x32xf32>
    %238 = vector.broadcast %237 : vector<1x32xf32> to vector<16x32xf32>
    %239 = arith.addf %236, %238 : vector<16x32xf32>
    %cst_97 = arith.constant 0.000000e+00 : f32
    %240 = vector.broadcast %cst_97 : f32 to vector<16x32xf32>
    %241 = arith.maximumf %239, %240 : vector<16x32xf32>
    %242 = arith.truncf %241 : vector<16x32xf32> to vector<16x32xbf16>
    %c0_98 = arith.constant 0 : index
    %c0_99 = arith.constant 0 : index
    %243 = vector.load %arg27[%c0_98, %c0_99] : memref<32x64xbf16, #tpu.memory_space<vmem>>, vector<32x64xbf16>
    %cst_100 = arith.constant dense<0.000000e+00> : vector<16x64xf32>
    %244 = tpu.matmul %242, %243, %cst_100 {dimension_numbers = #tpu.dot_dimension_numbers<[1], [0], [0], [1], [0, 0, 1, 1], [], []>} : vector<16x32xbf16>, vector<32x64xbf16>, vector<16x64xf32> -> vector<16x64xf32>
    %c0_101 = arith.constant 0 : index
    %c0_102 = arith.constant 0 : index
    %245 = vector.load %arg28[%c0_101, %c0_102] : memref<1x64xf32, #tpu.memory_space<vmem>>, vector<1x64xf32>
    %246 = vector.broadcast %245 : vector<1x64xf32> to vector<16x64xf32>
    %247 = arith.addf %244, %246 : vector<16x64xf32>
    %c0_103 = arith.constant 0 : index
    %c0_104 = arith.constant 0 : index
    %248 = vector.load %arg29[%c0_103, %c0_104] : memref<1x64xf32, #tpu.memory_space<vmem>>, vector<1x64xf32>
    %c0_105 = arith.constant 0 : index
    %c0_106 = arith.constant 0 : index
    %249 = vector.load %arg30[%c0_105, %c0_106] : memref<1x64xf32, #tpu.memory_space<vmem>>, vector<1x64xf32>
    %250 = arith.addf %233, %247 : vector<16x64xf32>
    %cst_107 = arith.constant dense<0.000000e+00> : vector<16xf32>
    %251 = vector.multi_reduction <add>, %250, %cst_107 [1] : vector<16x64xf32> to vector<16xf32>
    %252 = vector.shape_cast %251 : vector<16xf32> to vector<16x1xf32>
    %cst_108 = arith.constant 6.400000e+01 : f32
    %253 = vector.broadcast %cst_108 : f32 to vector<16x1xf32>
    %254 = arith.divf %252, %253 : vector<16x1xf32>
    %255 = vector.broadcast %254 : vector<16x1xf32> to vector<16x64xf32>
    %256 = arith.subf %250, %255 : vector<16x64xf32>
    %257 = arith.mulf %256, %256 : vector<16x64xf32>
    %cst_109 = arith.constant dense<0.000000e+00> : vector<16xf32>
    %258 = vector.multi_reduction <add>, %257, %cst_109 [1] : vector<16x64xf32> to vector<16xf32>
    %259 = vector.shape_cast %258 : vector<16xf32> to vector<16x1xf32>
    %cst_110 = arith.constant 6.400000e+01 : f32
    %260 = vector.broadcast %cst_110 : f32 to vector<16x1xf32>
    %261 = arith.divf %259, %260 : vector<16x1xf32>
    %262 = vector.broadcast %254 : vector<16x1xf32> to vector<16x64xf32>
    %263 = arith.subf %250, %262 : vector<16x64xf32>
    %cst_111 = arith.constant 9.99999974E-6 : f32
    %264 = vector.broadcast %cst_111 : f32 to vector<16x1xf32>
    %265 = arith.addf %261, %264 : vector<16x1xf32>
    %266 = math.rsqrt %265 : vector<16x1xf32>
    %267 = vector.broadcast %266 : vector<16x1xf32> to vector<16x64xf32>
    %268 = arith.mulf %263, %267 : vector<16x64xf32>
    %269 = vector.broadcast %248 : vector<1x64xf32> to vector<16x64xf32>
    %270 = arith.mulf %268, %269 : vector<16x64xf32>
    %271 = vector.broadcast %249 : vector<1x64xf32> to vector<16x64xf32>
    %272 = arith.addf %270, %271 : vector<16x64xf32>
    %273 = arith.truncf %272 : vector<16x64xf32> to vector<16x64xbf16>
    %c0_112 = arith.constant 0 : index
    %c0_113 = arith.constant 0 : index
    %274 = vector.load %arg31[%c0_112, %c0_113] : memref<64x32xbf16, #tpu.memory_space<vmem>>, vector<64x32xbf16>
    %cst_114 = arith.constant dense<0.000000e+00> : vector<16x32xf32>
    %275 = tpu.matmul %273, %274, %cst_114 {dimension_numbers = #tpu.dot_dimension_numbers<[1], [0], [0], [1], [0, 0, 1, 1], [], []>} : vector<16x64xbf16>, vector<64x32xbf16>, vector<16x32xf32> -> vector<16x32xf32>
    %c0_115 = arith.constant 0 : index
    %c0_116 = arith.constant 0 : index
    %276 = vector.load %arg32[%c0_115, %c0_116] : memref<1x32xf32, #tpu.memory_space<vmem>>, vector<1x32xf32>
    %277 = vector.broadcast %276 : vector<1x32xf32> to vector<16x32xf32>
    %278 = arith.addf %275, %277 : vector<16x32xf32>
    %cst_117 = arith.constant 0.000000e+00 : f32
    %279 = vector.broadcast %cst_117 : f32 to vector<16x32xf32>
    %280 = arith.cmpf oge, %278, %279 : vector<16x32xf32>
    %cst_118 = arith.constant 0.00999999977 : f32
    %281 = vector.broadcast %cst_118 : f32 to vector<16x32xf32>
    %282 = arith.mulf %281, %278 : vector<16x32xf32>
    %283 = arith.select %280, %278, %282 : vector<16x32xi1>, vector<16x32xf32>
    %284 = arith.truncf %283 : vector<16x32xf32> to vector<16x32xbf16>
    %c0_119 = arith.constant 0 : index
    %c0_120 = arith.constant 0 : index
    %285 = vector.load %arg33[%c0_119, %c0_120] : memref<32x128xbf16, #tpu.memory_space<vmem>>, vector<32x128xbf16>
    %cst_121 = arith.constant dense<0.000000e+00> : vector<16x128xf32>
    %286 = tpu.matmul %284, %285, %cst_121 {dimension_numbers = #tpu.dot_dimension_numbers<[1], [0], [0], [1], [0, 0, 1, 1], [], []>} : vector<16x32xbf16>, vector<32x128xbf16>, vector<16x128xf32> -> vector<16x128xf32>
    %c0_122 = arith.constant 0 : index
    %c0_123 = arith.constant 0 : index
    %287 = vector.load %arg34[%c0_122, %c0_123] : memref<1x128xf32, #tpu.memory_space<vmem>>, vector<1x128xf32>
    %288 = vector.broadcast %287 : vector<1x128xf32> to vector<16x128xf32>
    %289 = arith.addf %286, %288 : vector<16x128xf32>
    %290 = vector.shape_cast %289 : vector<16x128xf32> to vector<2x8x128xf32>
    %c0_124 = arith.constant 0 : index
    %c0_125 = arith.constant 0 : index
    %c0_126 = arith.constant 0 : index
    %291 = vector.load %arg35[%c0_124, %c0_125, %c0_126] : memref<2x8x128xf32, #tpu.memory_space<vmem>>, vector<2x8x128xf32>
    tpu.vector_store %arg35[%c0_124, %c0_125, %c0_126], %290 {strides = array<i32>} : memref<2x8x128xf32, #tpu.memory_space<vmem>>, vector<2x8x128xf32>,
    return
  }
  func.func @transform_0(%arg0: i32) -> (i32, i32, i32) {
    %c0_i32 = arith.constant 0 : i32
    %c0_i32_0 = arith.constant 0 : i32
    %c0_i32_1 = arith.constant 0 : i32
    return %arg0, %c0_i32, %c0_i32_0 : i32, i32, i32
  }
  func.func @transform_1(%arg0: i32) -> (i32, i32, i32) {
    %c0_i32 = arith.constant 0 : i32
    %c0_i32_0 = arith.constant 0 : i32
    %c0_i32_1 = arith.constant 0 : i32
    return %arg0, %c0_i32, %c0_i32_0 : i32, i32, i32
  }
  func.func @transform_2(%arg0: i32) -> (i32, i32) {
    %c0_i32 = arith.constant 0 : i32
    %c0_i32_0 = arith.constant 0 : i32
    %c0_i32_1 = arith.constant 0 : i32
    return %c0_i32, %c0_i32_0 : i32, i32
  }
  func.func @transform_3(%arg0: i32) -> (i32, i32) {
    %c0_i32 = arith.constant 0 : i32
    %c0_i32_0 = arith.constant 0 : i32
    %c0_i32_1 = arith.constant 0 : i32
    return %c0_i32, %c0_i32_0 : i32, i32
  }
  func.func @transform_4(%arg0: i32) -> (i32, i32) {
    %c0_i32 = arith.constant 0 : i32
    %c0_i32_0 = arith.constant 0 : i32
    %c0_i32_1 = arith.constant 0 : i32
    return %c0_i32, %c0_i32_0 : i32, i32
  }
  func.func @transform_5(%arg0: i32) -> (i32, i32) {
    %c0_i32 = arith.constant 0 : i32
    %c0_i32_0 = arith.constant 0 : i32
    %c0_i32_1 = arith.constant 0 : i32
    return %c0_i32, %c0_i32_0 : i32, i32
  }
  func.func @transform_6(%arg0: i32) -> (i32, i32) {
    %c0_i32 = arith.constant 0 : i32
    %c0_i32_0 = arith.constant 0 : i32
    %c0_i32_1 = arith.constant 0 : i32
    return %c0_i32, %c0_i32_0 : i32, i32
  }
  func.func @transform_7(%arg0: i32) -> (i32, i32) {
    %c0_i32 = arith.constant 0 : i32
    %c0_i32_0 = arith.constant 0 : i32
    %c0_i32_1 = arith.constant 0 : i32
    return %c0_i32, %c0_i32_0 : i32, i32
  }
  func.func @transform_8(%arg0: i32) -> (i32, i32) {
    %c0_i32 = arith.constant 0 : i32
    %c0_i32_0 = arith.constant 0 : i32
    %c0_i32_1 = arith.constant 0 : i32
    return %c0_i32, %c0_i32_0 : i32, i32
  }
  func.func @transform_9(%arg0: i32) -> (i32, i32) {
    %c0_i32 = arith.constant 0 : i32
    %c0_i32_0 = arith.constant 0 : i32
    %c0_i32_1 = arith.constant 0 : i32
    return %c0_i32, %c0_i32_0 : i32, i32
  }
  func.func @transform_10(%arg0: i32) -> (i32, i32) {
    %c0_i32 = arith.constant 0 : i32
    %c0_i32_0 = arith.constant 0 : i32
    %c0_i32_1 = arith.constant 0 : i32
    return %c0_i32, %c0_i32_0 : i32, i32
  }
  func.func @transform_11(%arg0: i32) -> (i32, i32) {
    %c0_i32 = arith.constant 0 : i32
    %c0_i32_0 = arith.constant 0 : i32
    %c0_i32_1 = arith.constant 0 : i32
    return %c0_i32, %c0_i32_0 : i32, i32
  }
  func.func @transform_12(%arg0: i32) -> (i32, i32) {
    %c0_i32 = arith.constant 0 : i32
    %c0_i32_0 = arith.constant 0 : i32
    %c0_i32_1 = arith.constant 0 : i32
    return %c0_i32, %c0_i32_0 : i32, i32
  }
  func.func @transform_13(%arg0: i32) -> (i32, i32) {
    %c0_i32 = arith.constant 0 : i32
    %c0_i32_0 = arith.constant 0 : i32
    %c0_i32_1 = arith.constant 0 : i32
    return %c0_i32, %c0_i32_0 : i32, i32
  }
  func.func @transform_14(%arg0: i32) -> (i32, i32) {
    %c0_i32 = arith.constant 0 : i32
    %c0_i32_0 = arith.constant 0 : i32
    %c0_i32_1 = arith.constant 0 : i32
    return %c0_i32, %c0_i32_0 : i32, i32
  }
  func.func @transform_15(%arg0: i32) -> (i32, i32) {
    %c0_i32 = arith.constant 0 : i32
    %c0_i32_0 = arith.constant 0 : i32
    %c0_i32_1 = arith.constant 0 : i32
    return %c0_i32, %c0_i32_0 : i32, i32
  }
  func.func @transform_16(%arg0: i32) -> (i32, i32) {
    %c0_i32 = arith.constant 0 : i32
    %c0_i32_0 = arith.constant 0 : i32
    %c0_i32_1 = arith.constant 0 : i32
    return %c0_i32, %c0_i32_0 : i32, i32
  }
  func.func @transform_17(%arg0: i32) -> (i32, i32) {
    %c0_i32 = arith.constant 0 : i32
    %c0_i32_0 = arith.constant 0 : i32
    %c0_i32_1 = arith.constant 0 : i32
    return %c0_i32, %c0_i32_0 : i32, i32
  }
  func.func @transform_18(%arg0: i32) -> (i32, i32) {
    %c0_i32 = arith.constant 0 : i32
    %c0_i32_0 = arith.constant 0 : i32
    %c0_i32_1 = arith.constant 0 : i32
    return %c0_i32, %c0_i32_0 : i32, i32
  }
  func.func @transform_19(%arg0: i32) -> (i32, i32) {
    %c0_i32 = arith.constant 0 : i32
    %c0_i32_0 = arith.constant 0 : i32
    %c0_i32_1 = arith.constant 0 : i32
    return %c0_i32, %c0_i32_0 : i32, i32
  }
  func.func @transform_20(%arg0: i32) -> (i32, i32) {
    %c0_i32 = arith.constant 0 : i32
    %c0_i32_0 = arith.constant 0 : i32
    %c0_i32_1 = arith.constant 0 : i32
    return %c0_i32, %c0_i32_0 : i32, i32
  }
  func.func @transform_21(%arg0: i32) -> (i32, i32) {
    %c0_i32 = arith.constant 0 : i32
    %c0_i32_0 = arith.constant 0 : i32
    %c0_i32_1 = arith.constant 0 : i32
    return %c0_i32, %c0_i32_0 : i32, i32
  }
  func.func @transform_22(%arg0: i32) -> (i32, i32) {
    %c0_i32 = arith.constant 0 : i32
    %c0_i32_0 = arith.constant 0 : i32
    %c0_i32_1 = arith.constant 0 : i32
    return %c0_i32, %c0_i32_0 : i32, i32
  }
  func.func @transform_23(%arg0: i32) -> (i32, i32) {
    %c0_i32 = arith.constant 0 : i32
    %c0_i32_0 = arith.constant 0 : i32
    %c0_i32_1 = arith.constant 0 : i32
    return %c0_i32, %c0_i32_0 : i32, i32
  }
  func.func @transform_24(%arg0: i32) -> (i32, i32) {
    %c0_i32 = arith.constant 0 : i32
    %c0_i32_0 = arith.constant 0 : i32
    %c0_i32_1 = arith.constant 0 : i32
    return %c0_i32, %c0_i32_0 : i32, i32
  }
  func.func @transform_25(%arg0: i32) -> (i32, i32) {
    %c0_i32 = arith.constant 0 : i32
    %c0_i32_0 = arith.constant 0 : i32
    %c0_i32_1 = arith.constant 0 : i32
    return %c0_i32, %c0_i32_0 : i32, i32
  }
  func.func @transform_26(%arg0: i32) -> (i32, i32) {
    %c0_i32 = arith.constant 0 : i32
    %c0_i32_0 = arith.constant 0 : i32
    %c0_i32_1 = arith.constant 0 : i32
    return %c0_i32, %c0_i32_0 : i32, i32
  }
  func.func @transform_27(%arg0: i32) -> (i32, i32) {
    %c0_i32 = arith.constant 0 : i32
    %c0_i32_0 = arith.constant 0 : i32
    %c0_i32_1 = arith.constant 0 : i32
    return %c0_i32, %c0_i32_0 : i32, i32
  }
  func.func @transform_28(%arg0: i32) -> (i32, i32) {
    %c0_i32 = arith.constant 0 : i32
    %c0_i32_0 = arith.constant 0 : i32
    %c0_i32_1 = arith.constant 0 : i32
    return %c0_i32, %c0_i32_0 : i32, i32
  }
  func.func @transform_29(%arg0: i32) -> (i32, i32) {
    %c0_i32 = arith.constant 0 : i32
    %c0_i32_0 = arith.constant 0 : i32
    %c0_i32_1 = arith.constant 0 : i32
    return %c0_i32, %c0_i32_0 : i32, i32
  }
  func.func @transform_30(%arg0: i32) -> (i32, i32) {
    %c0_i32 = arith.constant 0 : i32
    %c0_i32_0 = arith.constant 0 : i32
    %c0_i32_1 = arith.constant 0 : i32
    return %c0_i32, %c0_i32_0 : i32, i32
  }
  func.func @transform_31(%arg0: i32) -> (i32, i32) {
    %c0_i32 = arith.constant 0 : i32
    %c0_i32_0 = arith.constant 0 : i32
    %c0_i32_1 = arith.constant 0 : i32
    return %c0_i32, %c0_i32_0 : i32, i32
  }
  func.func @transform_32(%arg0: i32) -> (i32, i32) {
    %c0_i32 = arith.constant 0 : i32
    %c0_i32_0 = arith.constant 0 : i32
    %c0_i32_1 = arith.constant 0 : i32
    return %c0_i32, %c0_i32_0 : i32, i32
  }
  func.func @transform_33(%arg0: i32) -> (i32, i32) {
    %c0_i32 = arith.constant 0 : i32
    %c0_i32_0 = arith.constant 0 : i32
    %c0_i32_1 = arith.constant 0 : i32
    return %c0_i32, %c0_i32_0 : i32, i32
  }
  func.func @transform_34(%arg0: i32) -> (i32, i32, i32) {
    %c0_i32 = arith.constant 0 : i32
    %c0_i32_0 = arith.constant 0 : i32
    %c0_i32_1 = arith.constant 0 : i32
    return %arg0, %c0_i32, %c0_i32_0 : i32, i32, i32
  }
}

</mosaic_0001>

<bundles_post_ra>
// kernel: tpu_custom_call.1
= control target key start
LH: loop header
LB: loop body
LE: loop exit
PB: predicated region body
PF: predicated region fallthrough
CT: control target
= control target key end

     0   :  { %s3665_s6 = smov 1   ;;  %s3666_s10 = smov 2   ;;  %s4327_s0 = inlined_call_operand.smem [shape: u32[35], index: -1, kind: input, shape index: {}] }
   0x1   :  { %s3739_s5 = sld [smem:[%s4327_s0]]   ;;  %s3667_s14 = smov 3  }
   0x2   :  { %s3744_s9 = sld [smem:[%s4327_s0 + %s3665_s6]]   ;;  %s3668_s18 = smov 4  }
   0x3   :  { %s3749_s13 = sld [smem:[%s4327_s0 + %s3666_s10]]   ;;  %s3669_s22 = smov 5  }
   0x4   :  { %s3754_s17 = sld [smem:[%s4327_s0 + %s3667_s14]]   ;;  %s3670_s26 = smov 6  }
   0x5   :  { %s3759_s21 = sld [smem:[%s4327_s0 + %s3668_s18]]   ;;  %s3671_s30 = smov 7  }
   0x6   :  { %s3764_s25 = sld [smem:[%s4327_s0 + %s3669_s22]]   ;;  %s3672_s4 = smov 8  }
   0x7   :  { %s3769_s29 = sld [smem:[%s4327_s0 + %s3670_s26]]   ;;  %s3673_s10 = smov 9  }
   0x8   :  { %4344 = sst [smem:[#allocation48_spill]] %s3744_s9  ;;  %s3674_s15 = smov 10  }
   0x9   :  { %s3774_s3 = sld [smem:[%s4327_s0 + %s3671_s30]]   ;;  %s3675_s20 = smov 11  }
   0xa   :  { %s3779_s8 = sld [smem:[%s4327_s0 + %s3672_s4]]   ;;  %s3676_s26 = smov 12  }
   0xb   :  { %s3784_s14 = sld [smem:[%s4327_s0 + %s3673_s10]]   ;;  %s3677_s1 = smov 13  }
   0xc   :  { %s3789_s19 = sld [smem:[%s4327_s0 + %s3674_s15]]   ;;  %s3678_s7 = smov 14  }
   0xd   :  { %4345 = sst [smem:[#allocation49_spill]] %s3769_s29  ;;  %s3679_s15 = smov 15  }
   0xe   :  { %s3794_s24 = sld [smem:[%s4327_s0 + %s3675_s20]]   ;;  %s3680_s22 = smov 16  }
   0xf   :  { %s3799_s30 = sld [smem:[%s4327_s0 + %s3676_s26]]   ;;  %s3681_s28 = smov 17  }
  0x10   :  { %4346 = sst [smem:[#allocation50_spill]] %s3779_s8 }
  0x11   :  { %s3804_s6 = sld [smem:[%s4327_s0 + %s3677_s1]]  }
  0x12   :  { %s3809_s12 = sld [smem:[%s4327_s0 + %s3678_s7]]   ;;  %s3682_s7 = smov 18  }
  0x13   :  { %s3814_s20 = sld [smem:[%s4327_s0 + %s3679_s15]]   ;;  %s3683_s15 = smov 19  }
  0x14   :  { %4347 = sst [smem:[#allocation51_spill]] %s3794_s24 }
  0x15   :  { %4348 = sst [smem:[#allocation52_spill]] %s3799_s30 }
  0x16   :  { %s3819_s27 = sld [smem:[%s4327_s0 + %s3680_s22]]   ;;  %s3684_s22 = smov 20  }
  0x17   :  { %s3824_s4 = sld [smem:[%s4327_s0 + %s3681_s28]]   ;;  %s3685_s28 = smov 21  }
  0x18   :  { %4349 = sst [smem:[#allocation53_spill]] %s3809_s12 }
  0x19   :  { %s3829_s30 = sld [smem:[%s4327_s0 + %s3682_s7]]   ;;  %s3686_s7 = smov 22  }
  0x1a   :  { %s3834_s8 = sld [smem:[%s4327_s0 + %s3683_s15]]   ;;  %s3687_s15 = smov 23  }
  0x1b   :  { %s3839_s29 = sld [smem:[%s4327_s0 + %s3684_s22]]   ;;  %s3688_s22 = smov 24  }
  0x1c   :  { %4350 = sst [smem:[#allocation54_spill]] %s3819_s27 }
  0x1d   :  { %4351 = sst [smem:[#allocation55_spill]] %s3824_s4 }
  0x1e   :  { %s3844_s4 = sld [smem:[%s4327_s0 + %s3685_s28]]   ;;  %s3689_s28 = smov 25  }
  0x1f   :  { %4352 = sst [smem:[#allocation56_spill]] %s3829_s30 }
  0x20   :  { %s3849_s30 = sld [smem:[%s4327_s0 + %s3686_s7]]   ;;  %s3690_s7 = smov 26  }
  0x21   :  { %4353 = sst [smem:[#allocation57_spill]] %s3839_s29 }
  0x22   :  { %s3854_s9 = sld [smem:[%s4327_s0 + %s3687_s15]]   ;;  %s3691_s15 = smov 27  }
  0x23   :  { %s3859_s29 = sld [smem:[%s4327_s0 + %s3688_s22]]   ;;  %s3692_s22 = smov 28  }
  0x24   :  { %4354 = sst [smem:[#allocation58_spill]] %s3844_s4 }
  0x25   :  { %s3864_s4 = sld [smem:[%s4327_s0 + %s3689_s28]]   ;;  %s3693_s28 = smov 29  }
  0x26   :  { %s3869_s27 = sld [smem:[%s4327_s0 + %s3690_s7]]   ;;  %s3694_s7 = smov 30  }
  0x27   :  { %s3884_s12 = sld [smem:[%s4327_s0 + %s3693_s28]]   ;;  %s3697_s28 = smov 33  }
  0x28   :  { %4355 = sst [smem:[#allocation59_spill]] %s3854_s9 }
  0x29   :  { %4356 = sst [smem:[#allocation60_spill]] %s3859_s29 }
  0x2a   :  { %s3874_s9 = sld [smem:[%s4327_s0 + %s3691_s15]]   ;;  %s3695_s15 = smov 31  }
  0x2b   :  { %s3879_s29 = sld [smem:[%s4327_s0 + %s3692_s22]]   ;;  %s3696_s22 = smov 32  }
  0x2c   :  { %4357 = sst [smem:[#allocation61_spill]] %s3869_s27 }
  0x2d   :  { %4359 = sst [smem:[#allocation63_spill]] %s3884_s12 }
  0x2e   :  { %s3889_s27 = sld [smem:[%s4327_s0 + %s3694_s7]]   ;;  %s3698_s7 = smov 34  }
  0x2f   :  { %s3899_s24 = sld [smem:[%s4327_s0 + %s3696_s22]]  }
  0x30   :  { %4358 = sst [smem:[#allocation62_spill]] %s3874_s9 }
  0x31   :  { %s3894_s9 = sld [smem:[%s4327_s0 + %s3695_s15]]  }
  0x32   :  { %s3904_s12 = sld [smem:[%s4327_s0 + %s3697_s28]]  }
  0x34   :  { %4360 = sst [smem:[#allocation64_spill]] %s3889_s27 }
  0x35   :  { %s3909_s27 = sld [smem:[%s4327_s0 + %s3698_s7]]  }
  0x36   :  { %74 = vsyncpa [#allocation3], 0 }
  0x37   :  { %75 = vsyncpa [#allocation6], 0 }
  0x38   :  { %76 = vsyncpa [#allocation9], 0 }
  0x39   :  { %77 = vsyncpa [#allocation12], 0 }
  0x3a   :  { %78 = vsyncpa [#allocation15], 0 }
  0x3b   :  { %79 = vsyncpa [#allocation18], 0 }
  0x3c   :  { %80 = vsyncpa [#allocation21], 0 }
  0x3d   :  { %81 = vsyncpa [#allocation24], 0 }
  0x3e   :  { %82 = vsyncpa [#allocation27], 0 }
  0x3f   :  { %83 = vsyncpa [#allocation30], 0 }
  0x40   :  { %84 = vsyncpa [#allocation33], 0 }
  0x41   :  { %85 = vsyncpa [#allocation4], 0  ;;  %s3699_s15 = smov [#allocation5]   ;;  %s3700_s18 = smov [#allocation8]  }
  0x42   :  { %s105_s16 = sshll.u32 %s3699_s15, 4  ;;  %s127_s0 = sshll.u32 %s3700_s18, 4  ;;  %s106_s16 = int_to_ptr.vmem [resolvable:$true] %s105_s16  ;;  %s3911_s0 = int_to_ptr.vmem [resolvable:$true] %s127_s0 }
  0x43   :  { %s3157_s22 = scalar_lea.hbm %s3749_s13, 256 }
  0x44   :  { %p3158_p0 = scmp.ne.s32.totalorder %s3749_s13, %s3157_s22  ;;  %p3161_p1 = scmp.lt.u32.totalorder %s3157_s22, %s3749_s13 }
  0x46   :  { %p3163_p2 = pnand %p3161_p1, %p3158_p0 }
  0x48   :  { %3166 = shalt.err (!%p3163_p2)
}
  0x49   :  { %s3167_s23 = scalar_lea.vmem %s106_s16, 256  ;;  %p3172_p4 = scmp.lt.s32.totalorder %s106_s16, %s106_s16 }
  0x4a   :  { %p3168_p3 = scmp.ne.s32.totalorder %s106_s16, %s3167_s23  ;;  %p3173_p5 = scmp.lt.s32.totalorder %s3167_s23, %s3167_s23 }
  0x4c   :  { %p3174_p6 = por %p3173_p5, %p3172_p4 }
  0x4e   :  { %p3175_p7 = pnand %p3174_p6, %p3168_p3 }
  0x50   :  { %3178 = shalt.err (!%p3175_p7)
}
  0x51   :  { %s3701_s26 = smov 64   ;;  %s3702_s28 = smov 4  }
  0x52   :  { %111 = dma.hbm_to_vmem [thread:$0]  %s3749_s13, 256, %s106_s16, [#allocation6], %s3701_s26, %s3701_s26, %s3702_s28  }
  0x53   :  { %s3179_s1 = scalar_lea.hbm %s3759_s21, 256 }
  0x54   :  { %p3180_p8 = scmp.ne.s32.totalorder %s3759_s21, %s3179_s1  ;;  %p3183_p9 = scmp.lt.u32.totalorder %s3179_s1, %s3759_s21 }
  0x56   :  { %p3185_p10 = pnand %p3183_p9, %p3180_p8 }
  0x58   :  { %3188 = shalt.err (!%p3185_p10)
}
  0x59   :  { %s3189_s2 = scalar_lea.vmem %s3911_s0, 256  ;;  %p3194_p12 = scmp.lt.s32.totalorder %s3911_s0, %s3911_s0 }
  0x5a   :  { %p3190_p11 = scmp.ne.s32.totalorder %s3911_s0, %s3189_s2  ;;  %p3195_p13 = scmp.lt.s32.totalorder %s3189_s2, %s3189_s2 }
  0x5c   :  { %p3196_p0 = por %p3195_p13, %p3194_p12 }
  0x5e   :  { %p3197_p1 = pnand %p3196_p0, %p3190_p11 }
  0x60   :  { %3200 = shalt.err (!%p3197_p1)
}
  0x61   :  { %133 = dma.hbm_to_vmem [thread:$0]  %s3759_s21, 256, %s3911_s0, [#allocation9], %s3701_s26, %s3701_s26, %s3702_s28  }
  0x62   :  { %s3703_s13 = smov [#allocation11]   ;;  %s3704_s10 = smov [#allocation14]  }
  0x63   :  { %s152_s7 = sshll.u32 %s3703_s13, 4  ;;  %s174_s11 = sshll.u32 %s3704_s10, 4  ;;  %s153_s7 = int_to_ptr.vmem [resolvable:$true] %s152_s7  ;;  %s175_s11 = int_to_ptr.vmem [resolvable:$true] %s174_s11 }
  0x64   :  { %s3201_s15 = scalar_lea.hbm %s3774_s3, 32 }
  0x65   :  { %p3202_p2 = scmp.ne.s32.totalorder %s3774_s3, %s3201_s15  ;;  %p3205_p3 = scmp.lt.u32.totalorder %s3201_s15, %s3774_s3 }
  0x67   :  { %p3207_p4 = pnand %p3205_p3, %p3202_p2 }
  0x69   :  { %3210 = shalt.err (!%p3207_p4)
}
  0x6a   :  { %s3211_s16 = scalar_lea.vmem %s153_s7, 32  ;;  %p3216_p6 = scmp.lt.s32.totalorder %s153_s7, %s153_s7 }
  0x6b   :  { %p3212_p5 = scmp.ne.s32.totalorder %s153_s7, %s3211_s16  ;;  %p3217_p7 = scmp.lt.s32.totalorder %s3211_s16, %s3211_s16 }
  0x6d   :  { %p3218_p8 = por %p3217_p7, %p3216_p6 }
  0x6f   :  { %p3219_p9 = pnand %p3218_p8, %p3212_p5 }
  0x71   :  { %3222 = shalt.err (!%p3219_p9)
}
  0x72   :  { %155 = dma.hbm_to_vmem [thread:$0]  %s3774_s3, 32, %s153_s7, [#allocation12]  }
  0x73   :  { %s3223_s21 = scalar_lea.hbm %s3789_s19, 16 }
  0x74   :  { %p3224_p10 = scmp.ne.s32.totalorder %s3789_s19, %s3223_s21  ;;  %p3227_p11 = scmp.lt.u32.totalorder %s3223_s21, %s3789_s19 }
  0x76   :  { %p3229_p12 = pnand %p3227_p11, %p3224_p10 }
  0x78   :  { %3232 = shalt.err (!%p3229_p12)
}
  0x79   :  { %s3233_s18 = scalar_lea.vmem %s175_s11, 16  ;;  %s3237_s0 = scalar_lea.vmem %s175_s11, 32 }
  0x7a   :  { %p3234_p13 = scmp.ne.s32.totalorder %s175_s11, %s3233_s18  ;;  %p3238_p0 = scmp.lt.s32.totalorder %s175_s11, %s175_s11 }
  0x7b   :  { %p3239_p1 = scmp.lt.s32.totalorder %s3237_s0, %s3233_s18 }
  0x7d   :  { %p3240_p2 = por %p3239_p1, %p3238_p0 }
  0x7f   :  { %p3241_p3 = pnand %p3240_p2, %p3234_p13 }
  0x81   :  { %3244 = shalt.err (!%p3241_p3)
}
  0x82   :  { %177 = dma.hbm_to_vmem [thread:$0]  %s3789_s19, 16, %s175_s11, [#allocation15]  }
  0x83   :  { %s3705_s22 = smov [#allocation17]   ;;  %s3706_s23 = smov [#allocation20]  }
  0x84   :  { %s196_s3 = sshll.u32 %s3705_s22, 4  ;;  %s218_s1 = sshll.u32 %s3706_s23, 4  ;;  %s197_s3 = int_to_ptr.vmem [resolvable:$true] %s196_s3  ;;  %s219_s1 = int_to_ptr.vmem [resolvable:$true] %s218_s1 }
  0x85   :  { %s3245_s2 = scalar_lea.hbm %s3804_s6, 16 }
  0x86   :  { %p3246_p4 = scmp.ne.s32.totalorder %s3804_s6, %s3245_s2  ;;  %p3249_p5 = scmp.lt.u32.totalorder %s3245_s2, %s3804_s6 }
  0x88   :  { %p3251_p6 = pnand %p3249_p5, %p3246_p4 }
  0x8a   :  { %3254 = shalt.err (!%p3251_p6)
}
  0x8b   :  { %s3255_s13 = scalar_lea.vmem %s197_s3, 16  ;;  %s3259_s7 = scalar_lea.vmem %s197_s3, 32 }
  0x8c   :  { %p3256_p7 = scmp.ne.s32.totalorder %s197_s3, %s3255_s13  ;;  %p3260_p8 = scmp.lt.s32.totalorder %s197_s3, %s197_s3 }
  0x8d   :  { %p3261_p9 = scmp.lt.s32.totalorder %s3259_s7, %s3255_s13 }
  0x8f   :  { %p3262_p10 = por %p3261_p9, %p3260_p8 }
  0x91   :  { %p3263_p11 = pnand %p3262_p10, %p3256_p7 }
  0x93   :  { %3266 = shalt.err (!%p3263_p11)
}
  0x94   :  { %199 = dma.hbm_to_vmem [thread:$0]  %s3804_s6, 16, %s197_s3, [#allocation18]  }
  0x95   :  { %s3267_s19 = scalar_lea.hbm %s3814_s20, 16 }
  0x96   :  { %p3268_p12 = scmp.ne.s32.totalorder %s3814_s20, %s3267_s19  ;;  %p3271_p13 = scmp.lt.u32.totalorder %s3267_s19, %s3814_s20 }
  0x98   :  { %p3273_p0 = pnand %p3271_p13, %p3268_p12 }
  0x9a   :  { %3276 = shalt.err (!%p3273_p0)
}
  0x9b   :  { %s3277_s10 = scalar_lea.vmem %s219_s1, 16  ;;  %s3281_s11 = scalar_lea.vmem %s219_s1, 32 }
  0x9c   :  { %p3278_p1 = scmp.ne.s32.totalorder %s219_s1, %s3277_s10  ;;  %p3282_p2 = scmp.lt.s32.totalorder %s219_s1, %s219_s1 }
  0x9d   :  { %p3283_p3 = scmp.lt.s32.totalorder %s3281_s11, %s3277_s10 }
  0x9f   :  { %p3284_p4 = por %p3283_p3, %p3282_p2 }
  0xa1   :  { %p3285_p5 = pnand %p3284_p4, %p3278_p1 }
  0xa3   :  { %3288 = shalt.err (!%p3285_p5)
}
  0xa4   :  { %221 = dma.hbm_to_vmem [thread:$0]  %s3814_s20, 16, %s219_s1, [#allocation21]  }
  0xa5   :  { %s3707_s15 = smov [#allocation23]   ;;  %s3708_s16 = smov [#allocation26]  }
  0xa6   :  { %s242_s6 = sshll.u32 %s3707_s15, 4  ;;  %s264_s21 = sshll.u32 %s3708_s16, 4  ;;  %s243_s6 = int_to_ptr.vmem [resolvable:$true] %s242_s6  ;;  %s265_s21 = int_to_ptr.vmem [resolvable:$true] %s264_s21 }
  0xa7   :  { %s3289_s18 = scalar_lea.hbm %s3834_s8, 32 }
  0xa8   :  { %p3290_p6 = scmp.ne.s32.totalorder %s3834_s8, %s3289_s18  ;;  %p3293_p7 = scmp.lt.u32.totalorder %s3289_s18, %s3834_s8 }
  0xaa   :  { %p3295_p8 = pnand %p3293_p7, %p3290_p6 }
  0xac   :  { %3298 = shalt.err (!%p3295_p8)
}
  0xad   :  { %s3299_s0 = scalar_lea.vmem %s243_s6, 32  ;;  %p3304_p10 = scmp.lt.s32.totalorder %s243_s6, %s243_s6 }
  0xae   :  { %p3300_p9 = scmp.ne.s32.totalorder %s243_s6, %s3299_s0  ;;  %p3305_p11 = scmp.lt.s32.totalorder %s3299_s0, %s3299_s0 }
  0xb0   :  { %p3306_p12 = por %p3305_p11, %p3304_p10 }
  0xb2   :  { %p3307_p13 = pnand %p3306_p12, %p3300_p9 }
  0xb4   :  { %3310 = shalt.err (!%p3307_p13)
}
  0xb5   :  { %245 = dma.hbm_to_vmem [thread:$0]  %s3834_s8, 32, %s243_s6, [#allocation24]  }
  0xb6   :  { %s3311_s20 = scalar_lea.hbm %s3849_s30, 16 }
  0xb7   :  { %p3312_p0 = scmp.ne.s32.totalorder %s3849_s30, %s3311_s20  ;;  %p3315_p1 = scmp.lt.u32.totalorder %s3311_s20, %s3849_s30 }
  0xb9   :  { %p3317_p2 = pnand %p3315_p1, %p3312_p0 }
  0xbb   :  { %3320 = shalt.err (!%p3317_p2)
}
  0xbc   :  { %s3321_s22 = scalar_lea.vmem %s265_s21, 16  ;;  %s3325_s3 = scalar_lea.vmem %s265_s21, 32 }
  0xbd   :  { %p3322_p3 = scmp.ne.s32.totalorder %s265_s21, %s3321_s22  ;;  %p3326_p4 = scmp.lt.s32.totalorder %s265_s21, %s265_s21 }
  0xbe   :  { %p3327_p5 = scmp.lt.s32.totalorder %s3325_s3, %s3321_s22 }
  0xc0   :  { %p3328_p6 = por %p3327_p5, %p3326_p4 }
  0xc2   :  { %p3329_p7 = pnand %p3328_p6, %p3322_p3 }
  0xc4   :  { %3332 = shalt.err (!%p3329_p7)
}
  0xc5   :  { %267 = dma.hbm_to_vmem [thread:$0]  %s3849_s30, 16, %s265_s21, [#allocation27]  }
  0xc6   :  { %s3709_s23 = smov [#allocation29]   ;;  %s3710_s1 = smov [#allocation32]  }
  0xc7   :  { %s286_s8 = sshll.u32 %s3709_s23, 4  ;;  %s308_s2 = sshll.u32 %s3710_s1, 4  ;;  %s287_s8 = int_to_ptr.vmem [resolvable:$true] %s286_s8  ;;  %s309_s2 = int_to_ptr.vmem [resolvable:$true] %s308_s2 }
  0xc8   :  { %s3333_s13 = scalar_lea.hbm %s3864_s4, 16 }
  0xc9   :  { %p3334_p8 = scmp.ne.s32.totalorder %s3864_s4, %s3333_s13  ;;  %p3337_p9 = scmp.lt.u32.totalorder %s3333_s13, %s3864_s4 }
  0xcb   :  { %p3339_p10 = pnand %p3337_p9, %p3334_p8 }
  0xcd   :  { %3342 = shalt.err (!%p3339_p10)
}
  0xce   :  { %s3343_s7 = scalar_lea.vmem %s287_s8, 16  ;;  %s3347_s19 = scalar_lea.vmem %s287_s8, 32 }
  0xcf   :  { %p3344_p11 = scmp.ne.s32.totalorder %s287_s8, %s3343_s7  ;;  %p3348_p12 = scmp.lt.s32.totalorder %s287_s8, %s287_s8 }
  0xd0   :  { %p3349_p13 = scmp.lt.s32.totalorder %s3347_s19, %s3343_s7 }
  0xd2   :  { %p3350_p0 = por %p3349_p13, %p3348_p12 }
  0xd4   :  { %p3351_p1 = pnand %p3350_p0, %p3344_p11 }
  0xd6   :  { %3354 = shalt.err (!%p3351_p1)
}
  0xd7   :  { %289 = dma.hbm_to_vmem [thread:$0]  %s3864_s4, 16, %s287_s8, [#allocation30]  }
  0xd8   :  { %s3355_s30 = scalar_lea.hbm %s3879_s29, 16 }
  0xd9   :  { %p3356_p2 = scmp.ne.s32.totalorder %s3879_s29, %s3355_s30  ;;  %p3359_p3 = scmp.lt.u32.totalorder %s3355_s30, %s3879_s29 }
  0xdb   :  { %p3361_p4 = pnand %p3359_p3, %p3356_p2 }
  0xdd   :  { %3364 = shalt.err (!%p3361_p4)
}
  0xde   :  { %s3365_s10 = scalar_lea.vmem %s309_s2, 16  ;;  %s3369_s11 = scalar_lea.vmem %s309_s2, 32 }
  0xdf   :  { %p3366_p5 = scmp.ne.s32.totalorder %s309_s2, %s3365_s10  ;;  %p3370_p6 = scmp.lt.s32.totalorder %s309_s2, %s309_s2 }
  0xe0   :  { %p3371_p7 = scmp.lt.s32.totalorder %s3369_s11, %s3365_s10 }
  0xe2   :  { %p3372_p8 = por %p3371_p7, %p3370_p6 }
  0xe4   :  { %p3373_p9 = pnand %p3372_p8, %p3366_p5 }
  0xe6   :  { %3376 = shalt.err (!%p3373_p9)
}
  0xe7   :  { %311 = dma.hbm_to_vmem [thread:$0]  %s3879_s29, 16, %s309_s2, [#allocation33]  }
  0xe8   :  { %s3711_s15 = smov [#allocation2]   ;;  %s3712_s6 = smov [#allocation7]  }
  0xe9   :  { %s91_s4 = sshll.u32 %s3711_s15, 4  ;;  %s118_s16 = sshll.u32 %s3712_s6, 4  ;;  %s92_s4 = int_to_ptr.vmem [resolvable:$true] %s91_s4  ;;  %s119_s16 = int_to_ptr.vmem [resolvable:$true] %s118_s16 }
  0xea   :  { %s3377_s21 = scalar_lea.hbm %s3739_s5, 128 }
  0xeb   :  { %p3378_p10 = scmp.ne.s32.totalorder %s3739_s5, %s3377_s21  ;;  %p3381_p11 = scmp.lt.u32.totalorder %s3377_s21, %s3739_s5 }
  0xed   :  { %p3383_p12 = pnand %p3381_p11, %p3378_p10 }
  0xef   :  { %3386 = shalt.err (!%p3383_p12)
}
  0xf0   :  { %s3387_s18 = scalar_lea.vmem %s92_s4, 128  ;;  %p3392_p0 = scmp.lt.s32.totalorder %s92_s4, %s92_s4 }
  0xf1   :  { %p3388_p13 = scmp.ne.s32.totalorder %s92_s4, %s3387_s18  ;;  %p3393_p1 = scmp.lt.s32.totalorder %s3387_s18, %s3387_s18 }
  0xf3   :  { %p3394_p2 = por %p3393_p1, %p3392_p0 }
  0xf5   :  { %p3395_p3 = pnand %p3394_p2, %p3388_p13 }
  0xf7   :  { %3398 = shalt.err (!%p3395_p3)
}
  0xf8   :  { %97 = dma.hbm_to_vmem [thread:$0]  %s3739_s5, 128, %s92_s4, [#allocation3], %s3701_s26, %s3701_s26, %s3702_s28  }
  0xf9   :  { %s3399_s29 = scalar_lea.hbm %s3754_s17, 16 }
  0xfa   :  { %p3400_p4 = scmp.ne.s32.totalorder %s3754_s17, %s3399_s29  ;;  %p3403_p5 = scmp.lt.u32.totalorder %s3399_s29, %s3754_s17 }
  0xfc   :  { %p3405_p6 = pnand %p3403_p5, %p3400_p4 }
  0xfe   :  { %3408 = shalt.err (!%p3405_p6)
}
  0xff   :  { %s3409_s0 = scalar_lea.vmem %s119_s16, 16  ;;  %s3413_s20 = scalar_lea.vmem %s119_s16, 32 }
 0x100   :  { %p3410_p7 = scmp.ne.s32.totalorder %s119_s16, %s3409_s0  ;;  %p3414_p8 = scmp.lt.s32.totalorder %s119_s16, %s119_s16 }
 0x101   :  { %p3415_p9 = scmp.lt.s32.totalorder %s3413_s20, %s3409_s0 }
 0x103   :  { %p3416_p10 = por %p3415_p9, %p3414_p8 }
 0x105   :  { %p3417_p11 = pnand %p3416_p10, %p3410_p7 }
 0x107   :  { %3420 = shalt.err (!%p3417_p11)
}
 0x108   :  { %121 = dma.hbm_to_vmem [thread:$0]  %s3754_s17, 16, %s119_s16, [#allocation6]  }
 0x109   :  { %s3713_s22 = smov [#allocation10]   ;;  %s3714_s3 = smov [#allocation13]  }
 0x10a   :  { %s140_s5 = sshll.u32 %s3713_s22, 4  ;;  %s164_s23 = sshll.u32 %s3714_s3, 4  ;;  %s141_s5 = int_to_ptr.vmem [resolvable:$true] %s140_s5  ;;  %s165_s23 = int_to_ptr.vmem [resolvable:$true] %s164_s23 }
 0x10b   :  { %s3421_s8 = scalar_lea.hbm %s3764_s25, 16 }
 0x10c   :  { %p3422_p12 = scmp.ne.s32.totalorder %s3764_s25, %s3421_s8  ;;  %p3425_p13 = scmp.lt.u32.totalorder %s3421_s8, %s3764_s25 }
 0x10e   :  { %p3427_p0 = pnand %p3425_p13, %p3422_p12 }
 0x110   :  { %3430 = shalt.err (!%p3427_p0)
}
 0x111   :  { %s3431_s1 = scalar_lea.vmem %s141_s5, 16  ;;  %s3435_s2 = scalar_lea.vmem %s141_s5, 32 }
 0x112   :  { %p3432_p1 = scmp.ne.s32.totalorder %s141_s5, %s3431_s1  ;;  %p3436_p2 = scmp.lt.s32.totalorder %s141_s5, %s141_s5 }
 0x113   :  { %p3437_p3 = scmp.lt.s32.totalorder %s3435_s2, %s3431_s1 }
 0x115   :  { %p3438_p4 = por %p3437_p3, %p3436_p2 }
 0x117   :  { %p3439_p5 = pnand %p3438_p4, %p3432_p1 }
 0x119   :  { %3442 = shalt.err (!%p3439_p5)
}
 0x11a   :  { %143 = dma.hbm_to_vmem [thread:$0]  %s3764_s25, 16, %s141_s5, [#allocation9]  }
 0x11b   :  { %s3443_s17 = scalar_lea.hbm %s3784_s14, 16 }
 0x11c   :  { %p3444_p6 = scmp.ne.s32.totalorder %s3784_s14, %s3443_s17  ;;  %p3447_p7 = scmp.lt.u32.totalorder %s3443_s17, %s3784_s14 }
 0x11e   :  { %p3449_p8 = pnand %p3447_p7, %p3444_p6 }
 0x120   :  { %3452 = shalt.err (!%p3449_p8)
}
 0x121   :  { %s3453_s13 = scalar_lea.vmem %s165_s23, 16  ;;  %s3457_s7 = scalar_lea.vmem %s165_s23, 32 }
 0x122   :  { %p3454_p9 = scmp.ne.s32.totalorder %s165_s23, %s3453_s13  ;;  %p3458_p10 = scmp.lt.s32.totalorder %s165_s23, %s165_s23 }
 0x123   :  { %p3459_p11 = scmp.lt.s32.totalorder %s3457_s7, %s3453_s13 }
 0x125   :  { %p3460_p12 = por %p3459_p11, %p3458_p10 }
 0x127   :  { %p3461_p13 = pnand %p3460_p12, %p3454_p9 }
 0x129   :  { %3464 = shalt.err (!%p3461_p13)
}
 0x12a   :  { %s4361_s19 = sld [smem:[#allocation51_spill]]  ;;  %s3715_s30 = smov [#allocation16]  }
 0x12b   :  { %167 = dma.hbm_to_vmem [thread:$0]  %s3784_s14, 16, %s165_s23, [#allocation12]  }
 0x12c   :  { %s184_s25 = sshll.u32 %s3715_s30, 4  ;;  %s3716_s10 = smov [#allocation19]   ;;  %s185_s25 = int_to_ptr.vmem [resolvable:$true] %s184_s25 }
 0x12d   :  { %s205_s11 = sshll.u32 %s3716_s10, 4  ;;  %s3983_s11 = int_to_ptr.vmem [resolvable:$true] %s205_s11 }
 0x130   :  { %s3465_s15 = scalar_lea.hbm %s4361_s19, 16 }
 0x131   :  { %p3466_p0 = scmp.ne.s32.totalorder %s4361_s19, %s3465_s15  ;;  %p3469_p1 = scmp.lt.u32.totalorder %s3465_s15, %s4361_s19 }
 0x133   :  { %p3471_p2 = pnand %p3469_p1, %p3466_p0 }
 0x135   :  { %3474 = shalt.err (!%p3471_p2)
}
 0x136   :  { %s3475_s4 = scalar_lea.vmem %s185_s25, 16  ;;  %s3479_s6 = scalar_lea.vmem %s185_s25, 32 }
 0x137   :  { %p3476_p3 = scmp.ne.s32.totalorder %s185_s25, %s3475_s4  ;;  %p3480_p4 = scmp.lt.s32.totalorder %s185_s25, %s185_s25 }
 0x138   :  { %p3481_p5 = scmp.lt.s32.totalorder %s3479_s6, %s3475_s4 }
 0x13a   :  { %p3482_p6 = por %p3481_p5, %p3480_p4 }
 0x13c   :  { %p3483_p7 = pnand %p3482_p6, %p3476_p3 }
 0x13e   :  { %3486 = shalt.err (!%p3483_p7)
}
 0x13f   :  { %s4362_s14 = sld [smem:[#allocation53_spill]] }
 0x140   :  { %187 = dma.hbm_to_vmem [thread:$0]  %s4361_s19, 16, %s185_s25, [#allocation15]  }
 0x145   :  { %s3487_s16 = scalar_lea.hbm %s4362_s14, 256 }
 0x146   :  { %p3488_p8 = scmp.ne.s32.totalorder %s4362_s14, %s3487_s16  ;;  %p3491_p9 = scmp.lt.u32.totalorder %s3487_s16, %s4362_s14 }
 0x148   :  { %p3493_p10 = pnand %p3491_p9, %p3488_p8 }
 0x14a   :  { %3496 = shalt.err (!%p3493_p10)
}
 0x14b   :  { %s3497_s21 = scalar_lea.vmem %s3983_s11, 256  ;;  %p3502_p12 = scmp.lt.s32.totalorder %s3983_s11, %s3983_s11 }
 0x14c   :  { %p3498_p11 = scmp.ne.s32.totalorder %s3983_s11, %s3497_s21  ;;  %p3503_p13 = scmp.lt.s32.totalorder %s3497_s21, %s3497_s21 }
 0x14e   :  { %p3504_p0 = por %p3503_p13, %p3502_p12 }
 0x150   :  { %p3505_p1 = pnand %p3504_p0, %p3498_p11 }
 0x152   :  { %3508 = shalt.err (!%p3505_p1)
}
 0x153   :  { %s4363_s18 = sld [smem:[#allocation54_spill]]  ;;  %s3717_s29 = smov [#allocation22]  }
 0x154   :  { %211 = dma.hbm_to_vmem [thread:$0]  %s4362_s14, 256, %s3983_s11, [#allocation18], %s3701_s26, %s3701_s26, %s3702_s28  }
 0x155   :  { %s228_s0 = sshll.u32 %s3717_s29, 4  ;;  %s3718_s20 = smov [#allocation25]   ;;  %s229_s0 = int_to_ptr.vmem [resolvable:$true] %s228_s0 }
 0x156   :  { %s254_s22 = sshll.u32 %s3718_s20, 4  ;;  %s255_s22 = int_to_ptr.vmem [resolvable:$true] %s254_s22 }
 0x159   :  { %s3509_s5 = scalar_lea.hbm %s4363_s18, 16 }
 0x15a   :  { %p3510_p2 = scmp.ne.s32.totalorder %s4363_s18, %s3509_s5  ;;  %p3513_p3 = scmp.lt.u32.totalorder %s3509_s5, %s4363_s18 }
 0x15c   :  { %p3515_p4 = pnand %p3513_p3, %p3510_p2 }
 0x15e   :  { %3518 = shalt.err (!%p3515_p4)
}
 0x15f   :  { %s3519_s3 = scalar_lea.vmem %s229_s0, 16  ;;  %s3523_s23 = scalar_lea.vmem %s229_s0, 32 }
 0x160   :  { %p3520_p5 = scmp.ne.s32.totalorder %s229_s0, %s3519_s3  ;;  %p3524_p6 = scmp.lt.s32.totalorder %s229_s0, %s229_s0 }
 0x161   :  { %p3525_p7 = scmp.lt.s32.totalorder %s3523_s23, %s3519_s3 }
 0x163   :  { %p3526_p8 = por %p3525_p7, %p3524_p6 }
 0x165   :  { %p3527_p9 = pnand %p3526_p8, %p3520_p5 }
 0x167   :  { %3530 = shalt.err (!%p3527_p9)
}
 0x168   :  { %s4364_s28 = sld [smem:[#allocation58_spill]] }
 0x169   :  { %231 = dma.hbm_to_vmem [thread:$0]  %s4363_s18, 16, %s229_s0, [#allocation21]  }
 0x16e   :  { %s3531_s8 = scalar_lea.hbm %s4364_s28, 16 }
 0x16f   :  { %p3532_p10 = scmp.ne.s32.totalorder %s4364_s28, %s3531_s8  ;;  %p3535_p11 = scmp.lt.u32.totalorder %s3531_s8, %s4364_s28 }
 0x171   :  { %p3537_p12 = pnand %p3535_p11, %p3532_p10 }
 0x173   :  { %3540 = shalt.err (!%p3537_p12)
}
 0x174   :  { %s3541_s1 = scalar_lea.vmem %s255_s22, 16  ;;  %s3545_s2 = scalar_lea.vmem %s255_s22, 32 }
 0x175   :  { %p3542_p13 = scmp.ne.s32.totalorder %s255_s22, %s3541_s1  ;;  %p3546_p0 = scmp.lt.s32.totalorder %s255_s22, %s255_s22 }
 0x176   :  { %p3547_p1 = scmp.lt.s32.totalorder %s3545_s2, %s3541_s1 }
 0x178   :  { %p3548_p2 = por %p3547_p1, %p3546_p0 }
 0x17a   :  { %p3549_p3 = pnand %p3548_p2, %p3542_p13 }
 0x17c   :  { %3552 = shalt.err (!%p3549_p3)
}
 0x17d   :  { %s4365_s17 = sld [smem:[#allocation59_spill]]  ;;  %s3719_s13 = smov [#allocation28]  }
 0x17e   :  { %257 = dma.hbm_to_vmem [thread:$0]  %s4364_s28, 16, %s255_s22, [#allocation24]  }
 0x17f   :  { %s274_s7 = sshll.u32 %s3719_s13, 4  ;;  %s3720_s19 = smov [#allocation31]   ;;  %s275_s7 = int_to_ptr.vmem [resolvable:$true] %s274_s7 }
 0x180   :  { %s298_s30 = sshll.u32 %s3720_s19, 4  ;;  %s299_s30 = int_to_ptr.vmem [resolvable:$true] %s298_s30 }
 0x183   :  { %s3553_s25 = scalar_lea.hbm %s4365_s17, 16 }
 0x184   :  { %p3554_p4 = scmp.ne.s32.totalorder %s4365_s17, %s3553_s25  ;;  %p3557_p5 = scmp.lt.u32.totalorder %s3553_s25, %s4365_s17 }
 0x186   :  { %p3559_p6 = pnand %p3557_p5, %p3554_p4 }
 0x188   :  { %3562 = shalt.err (!%p3559_p6)
}
 0x189   :  { %s3563_s10 = scalar_lea.vmem %s275_s7, 16  ;;  %s3567_s11 = scalar_lea.vmem %s275_s7, 32 }
 0x18a   :  { %p3564_p7 = scmp.ne.s32.totalorder %s275_s7, %s3563_s10  ;;  %p3568_p8 = scmp.lt.s32.totalorder %s275_s7, %s275_s7 }
 0x18b   :  { %p3569_p9 = scmp.lt.s32.totalorder %s3567_s11, %s3563_s10 }
 0x18d   :  { %p3570_p10 = por %p3569_p9, %p3568_p8 }
 0x18f   :  { %p3571_p11 = pnand %p3570_p10, %p3564_p7 }
 0x191   :  { %3574 = shalt.err (!%p3571_p11)
}
 0x192   :  { %s4366_s15 = sld [smem:[#allocation62_spill]] }
 0x193   :  { %277 = dma.hbm_to_vmem [thread:$0]  %s4365_s17, 16, %s275_s7, [#allocation27]  }
 0x198   :  { %s3575_s4 = scalar_lea.hbm %s4366_s15, 16 }
 0x199   :  { %p3576_p12 = scmp.ne.s32.totalorder %s4366_s15, %s3575_s4  ;;  %p3579_p13 = scmp.lt.u32.totalorder %s3575_s4, %s4366_s15 }
 0x19b   :  { %p3581_p0 = pnand %p3579_p13, %p3576_p12 }
 0x19d   :  { %3584 = shalt.err (!%p3581_p0)
}
 0x19e   :  { %s3585_s6 = scalar_lea.vmem %s299_s30, 16  ;;  %s3589_s14 = scalar_lea.vmem %s299_s30, 32 }
 0x19f   :  { %p3586_p1 = scmp.ne.s32.totalorder %s299_s30, %s3585_s6  ;;  %p3590_p2 = scmp.lt.s32.totalorder %s299_s30, %s299_s30 }
 0x1a0   :  { %p3591_p3 = scmp.lt.s32.totalorder %s3589_s14, %s3585_s6 }
 0x1a2   :  { %p3592_p4 = por %p3591_p3, %p3590_p2 }
 0x1a4   :  { %p3593_p5 = pnand %p3592_p4, %p3586_p1 }
 0x1a6   :  { %3596 = shalt.err (!%p3593_p5)
}
 0x1a7   :  { %s4367_s16 = sld [smem:[#allocation63_spill]]  ;;  %s3721_s21 = smov [#allocation34]  }
 0x1a8   :  { %301 = dma.hbm_to_vmem [thread:$0]  %s4366_s15, 16, %s299_s30, [#allocation30]  }
 0x1a9   :  { %s318_s18 = sshll.u32 %s3721_s21, 4  ;;  %s319_s18 = int_to_ptr.vmem [resolvable:$true] %s318_s18 }
 0x1ad   :  { %s3597_s29 = scalar_lea.hbm %s4367_s16, 16 }
 0x1ae   :  { %p3598_p6 = scmp.ne.s32.totalorder %s4367_s16, %s3597_s29  ;;  %p3601_p7 = scmp.lt.u32.totalorder %s3597_s29, %s4367_s16 }
 0x1b0   :  { %p3603_p8 = pnand %p3601_p7, %p3598_p6 }
 0x1b2   :  { %3606 = shalt.err (!%p3603_p8)
}
 0x1b3   :  { %s3607_s0 = scalar_lea.vmem %s319_s18, 16  ;;  %s3611_s20 = scalar_lea.vmem %s319_s18, 32 }
 0x1b4   :  { %p3608_p9 = scmp.ne.s32.totalorder %s319_s18, %s3607_s0  ;;  %p3612_p10 = scmp.lt.s32.totalorder %s319_s18, %s319_s18 }
 0x1b5   :  { %p3613_p11 = scmp.lt.s32.totalorder %s3611_s20, %s3607_s0 }
 0x1b7   :  { %p3614_p12 = por %p3613_p11, %p3612_p10 }
 0x1b9   :  { %p3615_p13 = pnand %p3614_p12, %p3608_p9 }
 0x1bb   :  { %3618 = shalt.err (!%p3615_p13)
}
 0x1bc   :  { %321 = dma.hbm_to_vmem [thread:$0]  %s4367_s16, 16, %s319_s18, [#allocation33]  }
 0x1bd   :  { %3641 = dma.done.wait [#allocation3], 128  }
 0x1be   :  { %3642 = vsyncadd [#allocation3], 4294967168 }
 0x1bf   :  { %3643 = dma.done.wait [#allocation6], 272  }
 0x1c0   :  { %3644 = vsyncadd [#allocation6], 4294967024 }
 0x1c1   :  { %3645 = dma.done.wait [#allocation9], 272  }
 0x1c2   :  { %3646 = vsyncadd [#allocation9], 4294967024 }
 0x1c3   :  { %3647 = dma.done.wait [#allocation12], 48  }
 0x1c4   :  { %3648 = vsyncadd [#allocation12], 4294967248 }
 0x1c5   :  { %3649 = dma.done.wait [#allocation15], 32  }
 0x1c6   :  { %3650 = vsyncadd [#allocation15], 4294967264 }
 0x1c7   :  { %3651 = dma.done.wait [#allocation18], 272  }
 0x1c8   :  { %3652 = vsyncadd [#allocation18], 4294967024 }
 0x1c9   :  { %3653 = dma.done.wait [#allocation21], 32  }
 0x1ca   :  { %3654 = vsyncadd [#allocation21], 4294967264 }
 0x1cb   :  { %3655 = dma.done.wait [#allocation24], 48  }
 0x1cc   :  { %3656 = vsyncadd [#allocation24], 4294967248 }
 0x1cd   :  { %3657 = dma.done.wait [#allocation27], 32  }
 0x1ce   :  { %3658 = vsyncadd [#allocation27], 4294967264 }
 0x1cf   :  { %3659 = dma.done.wait [#allocation30], 32  }
 0x1d0   :  { %3660 = vsyncadd [#allocation30], 4294967264 }
 0x1d1   :  { %3661 = dma.done.wait [#allocation33], 32  }
 0x1d2   :  { %3662 = vsyncadd [#allocation33], 4294967264  ;;  %v3722_v0 = vmov 0.0   ;;  %v494_v1 = vlaneseq  ;;  %vm3723_vm0 = vmmov 0   ;;  %s4368_s22 = sld [smem:[#allocation48_spill]]  ;;  %v3054_v6 = vld [vmem:[#allocation8] sm:$0xff]  }
 0x1d3   :  { %2790 = vmatprep.subr.bf16.mxu1 %v3722_v0  ;;  %2782 = vmatprep.subr.bf16.mxu0 %v3722_v0  ;;  %v3724_v2 = vmov 1966171168   ;;  %s4369_s5 = sld [smem:[#allocation49_spill]]  ;;  %v3055_v7 = vld [vmem:[#allocation5] sm:$0xff]   ;;  %v3057_v10 = vld [vmem:[#allocation5 + $0x8] sm:$0xff]   ;;  %v3058_v15 = vld [vmem:[#allocation2] sm:$0xff]  }
 0x1d4   :  { %2794 = vmatprep.mubr.msk.bf16.mxu1 %vm3723_vm0, %v3722_v0  ;;  %v492_v3 = vunpack.c.l.s4 %v3724_v2  ;;  %2786 = vmatprep.mubr.msk.bf16.mxu0 %vm3723_vm0, %v3722_v0  ;;  %v4027_v5 = vshrl.u32 %v494_v1, 7  ;;  %v3056_v8 = vld [vmem:[#allocation8 + $0x8] sm:$0xff]   ;;  %vm424_vm1 = vcmask 261120   ;;  %vm515_vm2 = vcmask 1041409   ;;  %v2620_v33 = vld [vmem:[#allocation10] ss:$0 sm:$0xff] }
 0x1d5   :  { %2791 = vmatpush3.bf16.msra.mxu1 %v3054_v6  ;;  %2783 = vmatpush3.bf16.msra.mxu0 %v3055_v7  ;;  %v3725_v29 = vmov 0   ;;  %v2615_v39 = vld [vmem:[#allocation7] ss:$0 sm:$0xff]  ;;  %vm669_vm3 = vcmask 523264   ;;  %v617_v53 = vld [vmem:[#allocation11] sm:$0x3] }
 0x1d6   :  { %v493_v4 = vunpack.c.0.s8 %v492_v3  ;;  %2792 = vmatprep.subr.bf16.mxu1 %v3722_v0  ;;  %2784 = vmatprep.subr.bf16.mxu0 %v3722_v0  ;;  %v4050_v41 = vsub.s32 0, %v4027_v5  ;;  %v625_v54 = vsub.s32 1, %v4027_v5  ;;  %vm848_vm4 = vcmask 1043456   ;;  %s3726_s3 = smov 32   ;;  %s3727_s23 = smov 96  }
 0x1d7   :  { %vm820_vm5 = vcmask 64512   ;;  %s4370_s28 = sld [smem:[#allocation50_spill]]  ;;  %s4371_s8 = sld [smem:[#allocation52_spill]] }
 0x1d8   :  { %v496_v9 = vsub.s32 %v493_v4, %v4027_v5  ;;  %v2621_v11 = vld.sshfl [vmem:[%s4368_s22] sm:$0x1 pattern:$0x75316420]  ;;  %v622_v55 = vrot.slane %v617_v53, %v4050_v41  ;;  %v626_v56 = vrot.slane %v617_v53, %v625_v54  ;;  %s4372_s1 = sld [smem:[#allocation56_spill]]  ;;  %s4373_s2 = sld [smem:[#allocation55_spill]] }
 0x1d9   :  { %v2622_v12 = vld.sshfl [vmem:[%s4368_s22 + $0x1] sm:$0x1 pattern:$0x75316420]  ;;  %2793 = vmatpush3.bf16.msra.mxu1 %v3056_v8  ;;  %2785 = vmatpush3.bf16.msra.mxu0 %v3057_v10  ;;  %v3061_v17 = vld [vmem:[%s4369_s5 + $0x4] ss:$8 sps:$4 sm:$0xff]  }
 0x1da   :  { %v497_v13 = vrot.slane %v2621_v11, %v496_v9  ;;  %v511_v14 = vrot.slane %v2622_v12, %v496_v9  ;;  %v3059_v16 = vld [vmem:[%s4369_s5] ss:$8 sps:$4 sm:$0xff]   ;;  %2798 = vmatprep.subr.bf16.mxu1 %v3722_v0  ;;  %673 = vmatprep.subr.bf16.mxu0 %v3061_v17  ;;  %v3064_v23 = vld [vmem:[%s4369_s5 + $0x14] ss:$8 sps:$4 sm:$0xff]   ;;  %v3062_v24 = vld [vmem:[%s4369_s5 + $0x10] ss:$8 sps:$4 sm:$0xff]  }
 0x1db   :  { %v3067_v25 = vld [vmem:[%s4369_s5 + $0x24] ss:$8 sps:$4 sm:$0xff]   ;;  %v3065_v26 = vld [vmem:[%s4369_s5 + $0x20] ss:$8 sps:$4 sm:$0xff]   ;;  %v3070_v27 = vld [vmem:[%s4369_s5 + $0x34] ss:$8 sps:$4 sm:$0xff]  }
 0x1dc   :  { %v512_v18 = vunpack.c.l.b16 %v497_v13  ;;  %v513_v19 = vunpack.c.l.b16 %v511_v14  ;;  %2787 = vmatmul.mubr.msk.bf16.vlgmr.msra.gmra.mrb[0].mxu0 %vm424_vm1, %v3058_v15  ;;  %v3068_v28 = vld [vmem:[%s4369_s5 + $0x30] ss:$8 sps:$4 sm:$0xff]   ;;  %s4375_s17 = sld [smem:[#allocation60_spill]]  ;;  %s4376_s13 = sld [smem:[#allocation61_spill]] }
 0x1dd   :  { %674 = vmatpush1.bf16.msra.mxu0 %v3059_v16  ;;  %705 = vmatprep.mubr.bf16.mxu0 %v3725_v29  ;;  %s4377_s7 = sld [smem:[#allocation64_spill]] }
 0x1de   :  { %v514_v20 = vrot.slane %v513_v19, 7  ;;  %675 = vmatprep.subr.bf16.mxu0 %v3064_v23 }
 0x1e0   :  { %v516_v21 = vsel %vm515_vm2, %v514_v20, %v512_v18 }
 0x1e1   :  { %v517_v22 = vpack.c.b16 %v516_v21, %v516_v21  ;;  %676 = vmatpush1.bf16.msra.mxu0 %v3062_v24 }
 0x1e2   :  { %677 = vmatprep.subr.bf16.mxu0 %v3067_v25 }
 0x1e3   :  { %2795 = vmatmul.mubr.msk.bf16.vlgmr.msra.gmra.mrb[0].mxu1 %vm424_vm1, %v517_v22 }
 0x1e4   :  { %2800 = vmatprep.mubr.msk.bf16.mxu1 %vm3723_vm0, %v3722_v0 }
 0x1e5   :  { %678 = vmatpush1.bf16.msra.mxu0 %v3065_v26 }
 0x1e6   :  { %679 = vmatprep.subr.bf16.mxu0 %v3070_v27 }
 0x1e9   :  { %680 = vmatpush1.bf16.msra.mxu0 %v3068_v28 }
 0x1ea   :  { %2810 = vmatprep.subr.bf16.mxu0 %v3722_v0 }
 0x2af   :  { %v462_v30 = vpop.f32.mrb[0].mxu0 }
 0x2b0   :  { %v2788_v31 = vpop.f32.mrb[1].mxu0  ;;  %v463_v45 = vadd.f32 %v2615_v39, %v462_v30 }
 0x2b1   :  { %v465_v32 = vpop.f32.mrb[2].mxu0 }
 0x2b2   :  { %v2789_v34 = vpop.f32.mrb[3].mxu0  ;;  %v466_v49 = vadd.f32 %v2615_v39, %v465_v32 }
 0x2b6   :  { %v567_v35 = vpop.f32.mrb[0].mxu1 }
 0x2b7   :  { %v568_v36 = vadd.f32 %v2620_v33, %v567_v35  ;;  %v2796_v37 = vpop.f32.mrb[1].mxu1 }
 0x2b8   :  { %v570_v38 = vpop.f32.mrb[2].mxu1 }
 0x2b9   :  { %v580_v40 = vrot.slane %v568_v36, %v496_v9  ;;  %v2797_v42 = vpop.f32.mrb[3].mxu1 }
 0x2bb   :  { %v581_v43 = vcombine.high %v580_v40, %v580_v40  ;;  %v588_v44 = vrot.slane %v580_v40, %v496_v9 }
 0x2bd   :  { %v599_v46 = vrot.slane %v588_v44, %v4050_v41  ;;  %v595_v47 = vrot.slane %v581_v43, %v496_v9 }
 0x2bf   :  { %v4053_v48 = vadd.f32 %v599_v46, %v463_v45  ;;  %v603_v50 = vrot.slane %v595_v47, %v4050_v41 }
 0x2c1   :  { %v4056_v51 = vadd.f32 %v603_v50, %v466_v49 }
 0x2c3   :  { %v608_v52 = vpack.c.bf16 %v4056_v51, %v4053_v48 }
 0x2c5   :  { %2634 = vmatmul.mubr.msk.bf16.vlgmr.msra.gmra.mrb[4].mxu0 %vm669_vm3, %v608_v52 }
 0x2c6   :  { %2812 = vmatprep.mubr.msk.bf16.mxu0 %vm3723_vm0, %v3722_v0 }
 0x398   :  { %v707_v57 = vpop.f32.mrb[4].mxu0 }
 0x399   :  { %v708_v58 = vadd.f32 %v707_v57, %v622_v55  ;;  %v709_v59 = vpop.f32.mrb[5].mxu0 }
 0x39a   :  { %v710_v60 = vadd.f32 %v709_v59, %v626_v56  ;;  %v711_v61 = vpop.f32.mrb[6].mxu0 }
 0x39b   :  { %v716_v62 = vpack.c.bf16 %v708_v58, %v708_v58  ;;  %v712_v63 = vadd.f32 %v711_v61, %v622_v55  ;;  %v713_v1 = vpop.f32.mrb[7].mxu0 }
 0x39c   :  { %v4067_v2 = vpack.c.bf16 %v710_v60, %v710_v60  ;;  %v714_v3 = vadd.f32 %v713_v1, %v626_v56 }
 0x39d   :  { %721 = vrot.lane.b32.xlu0 %v716_v62, %s3701_s26  ;;  %v717_v6 = vpack.c.bf16 %v712_v63, %v712_v63 }
 0x39e   :  { %v850_v4 = vsel %vm848_vm4, %v4067_v2, 0  ;;  %v4081_v11 = vpack.c.bf16 %v714_v3, %v714_v3 }
 0x39f   :  { %2811 = vmatpush3.bf16.msra.mxu0 %v850_v4 }
 0x3a0   :  { %2822 = vmatprep.subr.bf16.mxu0 %v3722_v0  ;;  %v896_v12 = vsel %vm848_vm4, %v4081_v11, 0 }
 0x3a1   :  { %770 = vrot.lane.b32.xlu0 %v717_v6, %s3701_s26 }
 0x40f   :  { %v722_v7 = vpop.permute.xlu0 %721 }
 0x410   :  { %v727_v8 = vsel %vm424_vm1, %v722_v7, 0 }
 0x411   :  { %2799 = vmatpush3.bf16.xpose.msra.mxu1 %v727_v8 }
 0x412   :  { %2804 = vmatprep.subr.bf16.mxu1 %v3722_v0 }
 0x413   :  { %v771_v9 = vpop.permute.xlu0 %770 }
 0x414   :  { %v776_v10 = vsel %vm424_vm1, %v771_v9, 0 }
 0x418   :  { %2801 = vmatmul.mubr.msk.bf16.vlgmr.msra.gmra.mrb[4].mxu1 %vm424_vm1, %v716_v62 }
 0x419   :  { %2805 = vmatpush3.bf16.xpose.msra.mxu1 %v776_v10  ;;  %2806 = vmatprep.mubr.msk.bf16.mxu1 %vm3723_vm0, %v3722_v0 }
 0x41a   :  { %2816 = vmatprep.subr.bf16.mxu1 %v3722_v0 }
 0x420   :  { %2807 = vmatmul.mubr.msk.bf16.vlgmr.msra.gmra.mrb[8].mxu1 %vm424_vm1, %v717_v6 }
 0x421   :  { %2817 = vmatpush3.bf16.msra.mxu1 %v896_v12  ;;  %2818 = vmatprep.mubr.msk.bf16.mxu1 %vm3723_vm0, %v3722_v0 }
 0x422   :  { %2828 = vmatprep.subr.bf16.mxu1 %v3722_v0 }
 0x4eb   :  { %v763_v13 = vpop.f32.mrb[4].mxu1 }
 0x4ec   :  { %v818_v14 = vmul.f32 0.17677669, %v763_v13  ;;  %v2802_v15 = vpop.f32.mrb[5].mxu1 }
 0x4ed   :  { %v766_v16 = vpop.f32.mrb[6].mxu1 }
 0x4ee   :  { %v2803_v17 = vpop.f32.mrb[7].mxu1  ;;  %v821_v18 = vsel %vm820_vm5, %v818_v14, -inf }
 0x4ef   :  { %822 = vmax.xlane.f32.xlu1 %v821_v18 }
 0x4f3   :  { %v812_v19 = vpop.f32.mrb[8].mxu1 }
 0x4f4   :  { %v819_v20 = vmul.f32 0.17677669, %v812_v19  ;;  %v2808_v21 = vpop.f32.mrb[9].mxu1 }
 0x4f5   :  { %v815_v22 = vpop.f32.mrb[10].mxu1 }
 0x4f6   :  { %v2809_v23 = vpop.f32.mrb[11].mxu1  ;;  %v824_v24 = vsel %vm820_vm5, %v819_v20, -inf }
 0x4f7   :  { %825 = vmax.xlane.f32.xlu1 %v824_v24 }
 0x508   :  { %940 = vrot.lane.b32.xlu1 %v716_v62, %s3726_s3 }
 0x50c   :  { %990 = vrot.lane.b32.xlu1 %v717_v6, %s3726_s3 }
 0x57c   :  { %v823_v25 = vpop.xlane.xlu1 %822 }
 0x57d   :  { %v827_v26 = vsub.f32 %v818_v14, %v823_v25 }
 0x57f   :  { %v829_v27 = vmul.f32 1.442695, %v827_v26 }
 0x581   :  { %3109 = vpow2.f32 %v829_v27 }
 0x584   :  { %v826_v28 = vpop.xlane.xlu1 %825 }
 0x585   :  { %v828_v30 = vsub.f32 %v819_v20, %v826_v28 }
 0x587   :  { %v831_v31 = vmul.f32 1.442695, %v828_v30 }
 0x588   :  { %v941_v36 = vpop.permute.xlu1 %940 }
 0x589   :  { %3111 = vpow2.f32 %v831_v31  ;;  %v946_v44 = vsel %vm424_vm1, %v941_v36, 0  ;;  %v3072_v36 = vld [vmem:[%s4370_s28 + $0x8] sm:$0xff]  }
 0x58b   :  { %v3110_v32 = vpop.eup %3109 }
 0x58c   :  { %v833_v33 = vsel %vm820_vm5, %v3110_v32, 0.0  ;;  %v991_v38 = vpop.permute.xlu1 %990 }
 0x58d   :  { %834 = vadd.xlane.f32.xlu0 %v833_v33  ;;  %v996_v50 = vsel %vm424_vm1, %v991_v38, 0  ;;  %v3074_v38 = vld [vmem:[%s4370_s28 + $0x18] sm:$0xff]  }
 0x593   :  { %v3112_v34 = vpop.eup %3111 }
 0x594   :  { %v836_v35 = vsel %vm820_vm5, %v3112_v34, 0.0 }
 0x595   :  { %837 = vadd.xlane.f32.xlu1 %v836_v35  ;;  %v3071_v35 = vld [vmem:[%s4370_s28] sm:$0xff]  }
 0x5a6   :  { %938 = vrot.lane.b32.xlu1 %v716_v62, %s3727_s23 }
 0x5aa   :  { %988 = vrot.lane.b32.xlu1 %v717_v6, %s3727_s23 }
 0x61a   :  { %v835_v37 = vpop.xlane.xlu0 %834 }
 0x61b   :  { %3113 = vrcp.f32 %v835_v37  ;;  %v3073_v37 = vld [vmem:[%s4370_s28 + $0x10] sm:$0xff]  }
 0x622   :  { %v838_v39 = vpop.xlane.xlu1 %837 }
 0x623   :  { %3115 = vrcp.f32 %v838_v39 }
 0x625   :  { %v3114_v40 = vpop.eup %3113 }
 0x626   :  { %v841_v42 = vmul.f32 %v3114_v40, %v3110_v32  ;;  %v939_v49 = vpop.permute.xlu1 %938 }
 0x628   :  { %v843_v43 = vpack.c.bf16 %v841_v42, %v841_v42 }
 0x62a   :  { %2813 = vmatmul.mubr.msk.bf16.vlgmr.msra.gmra.mrb[8].mxu0 %vm820_vm5, %v843_v43  ;;  %v989_v52 = vpop.permute.xlu1 %988 }
 0x62b   :  { %2823 = vmatpush3.bf16.xpose.msra.mxu0 %v946_v44  ;;  %2824 = vmatprep.mubr.msk.bf16.mxu0 %vm3723_vm0, %v3722_v0 }
 0x62c   :  { %2834 = vmatprep.subr.bf16.mxu0 %v3722_v0 }
 0x62d   :  { %v3116_v45 = vpop.eup %3115 }
 0x62e   :  { %v842_v46 = vmul.f32 %v3116_v45, %v3112_v34 }
 0x630   :  { %v844_v47 = vpack.c.bf16 %v842_v46, %v842_v46 }
 0x632   :  { %2819 = vmatmul.mubr.msk.bf16.vlgmr.msra.gmra.mrb[12].mxu1 %vm820_vm5, %v844_v47  ;;  %2825 = vmatmul.mubr.msk.bf16.vlgmr.msra.gmra.mrb[12].mxu0 %vm424_vm1, %v939_v49 }
 0x633   :  { %2829 = vmatpush3.bf16.xpose.msra.mxu1 %v996_v50  ;;  %2830 = vmatprep.mubr.msk.bf16.mxu1 %vm3723_vm0, %v3722_v0 }
 0x634   :  { %2840 = vmatprep.subr.bf16.mxu1 %v3722_v0  ;;  %2836 = vmatprep.mubr.msk.bf16.mxu0 %vm3723_vm0, %v3722_v0 }
 0x63a   :  { %2831 = vmatmul.mubr.msk.bf16.vlgmr.msra.gmra.mrb[16].mxu1 %vm424_vm1, %v989_v52 }
 0x63b   :  { %2842 = vmatprep.mubr.msk.bf16.mxu1 %vm3723_vm0, %v3722_v0 }
 0x6fd   :  { %v4113_v53 = vpop.f32.mrb[8].mxu0 }
 0x6fe   :  { %v2814_v55 = vpop.f32.mrb[9].mxu0 }
 0x6ff   :  { %v889_v56 = vpop.f32.mrb[10].mxu0 }
 0x700   :  { %v2815_v57 = vpop.f32.mrb[11].mxu0 }
 0x705   :  { %v4115_v58 = vpop.f32.mrb[12].mxu1  ;;  %v982_v59 = vpop.f32.mrb[12].mxu0 }
 0x706   :  { %v1038_v60 = vmul.f32 0.17677669, %v982_v59  ;;  %v2820_v61 = vpop.f32.mrb[13].mxu1  ;;  %v2826_v62 = vpop.f32.mrb[13].mxu0 }
 0x707   :  { %v935_v63 = vpop.f32.mrb[14].mxu1  ;;  %v985_v1 = vpop.f32.mrb[14].mxu0 }
 0x708   :  { %v2821_v3 = vpop.f32.mrb[15].mxu1  ;;  %v2827_v4 = vpop.f32.mrb[15].mxu0  ;;  %v1040_v6 = vsel %vm820_vm5, %v1038_v60, -inf }
 0x709   :  { %1041 = vmax.xlane.f32.xlu0 %v1040_v6 }
 0x70d   :  { %v1032_v7 = vpop.f32.mrb[16].mxu1 }
 0x70e   :  { %v1039_v8 = vmul.f32 0.17677669, %v1032_v7  ;;  %v2832_v9 = vpop.f32.mrb[17].mxu1 }
 0x70f   :  { %v1035_v10 = vpop.f32.mrb[18].mxu1 }
 0x710   :  { %v2833_v12 = vpop.f32.mrb[19].mxu1  ;;  %v1043_v13 = vsel %vm820_vm5, %v1039_v8, -inf }
 0x711   :  { %1044 = vmax.xlane.f32.xlu1 %v1043_v13 }
 0x71f   :  { %1065 = vrot.lane.b32.xlu0 %v4067_v2, %s3727_s23 }
 0x796   :  { %v1042_v14 = vpop.xlane.xlu0 %1041 }
 0x797   :  { %v1046_v15 = vsub.f32 %v1038_v60, %v1042_v14  ;;  %v2643_v60 = vld [vmem:[#allocation13] ss:$0 sm:$0xff] }
 0x799   :  { %v1048_v16 = vmul.f32 1.442695, %v1046_v15 }
 0x79a   :  { %v1066_v17 = vpop.permute.xlu0 %1065 }
 0x79b   :  { %3117 = vpow2.f32 %v1048_v16  ;;  %v1071_v18 = vsel %vm848_vm4, %v1066_v17, 0  ;;  %v3075_v17 = vld [vmem:[%s4371_s8] sm:$0xff]  }
 0x79c   :  { %2835 = vmatpush3.bf16.msra.mxu0 %v1071_v18  ;;  %v3076_v18 = vld [vmem:[%s4371_s8 + $0x8] sm:$0xff]  }
 0x79d   :  { %2846 = vmatprep.subr.bf16.mxu0 %v3722_v0 }
 0x79e   :  { %v1045_v19 = vpop.xlane.xlu1 %1044 }
 0x79f   :  { %v1047_v20 = vsub.f32 %v1039_v8, %v1045_v19  ;;  %v3077_v19 = vld [vmem:[%s4371_s8 + $0x10] sm:$0xff]  }
 0x7a1   :  { %v1050_v21 = vmul.f32 1.442695, %v1047_v20  ;;  %v3078_v20 = vld [vmem:[%s4371_s8 + $0x18] sm:$0xff]  }
 0x7a3   :  { %3119 = vpow2.f32 %v1050_v21 }
 0x7a5   :  { %v3118_v22 = vpop.eup %3117 }
 0x7a6   :  { %v1052_v23 = vsel %vm820_vm5, %v3118_v22, 0.0 }
 0x7a7   :  { %1053 = vadd.xlane.f32.xlu0 %v1052_v23 }
 0x7ad   :  { %v3120_v24 = vpop.eup %3119 }
 0x7ae   :  { %v1055_v2 = vsel %vm820_vm5, %v3120_v24, 0.0 }
 0x7af   :  { %1056 = vadd.xlane.f32.xlu0 %v1055_v2 }
 0x7c5   :  { %1114 = vrot.lane.b32.xlu0 %v4081_v11, %s3727_s23 }
 0x834   :  { %v1054_v25 = vpop.xlane.xlu0 %1053 }
 0x835   :  { %3121 = vrcp.f32 %v1054_v25 }
 0x83c   :  { %v1057_v26 = vpop.xlane.xlu0 %1056 }
 0x83d   :  { %3123 = vrcp.f32 %v1057_v26 }
 0x83f   :  { %v3122_v27 = vpop.eup %3121 }
 0x840   :  { %v1060_v28 = vmul.f32 %v3122_v27, %v3118_v22  ;;  %v1115_v30 = vpop.permute.xlu0 %1114 }
 0x841   :  { %v1120_v31 = vsel %vm848_vm4, %v1115_v30, 0 }
 0x842   :  { %2841 = vmatpush3.bf16.msra.mxu1 %v1120_v31  ;;  %v1062_v32 = vpack.c.bf16 %v1060_v28, %v1060_v28  ;;  %v2649_v28 = vld [vmem:[#allocation14] ss:$0 sm:$0xff] }
 0x843   :  { %2858 = vmatprep.subr.bf16.mxu1 %v3722_v0 }
 0x844   :  { %2837 = vmatmul.mubr.msk.bf16.vlgmr.msra.gmra.mrb[16].mxu0 %vm820_vm5, %v1062_v32 }
 0x845   :  { %2854 = vmatprep.mubr.msk.bf16.mxu0 %vm3723_vm0, %v3722_v0  ;;  %2847 = vmatpush3.bf16.msra.mxu0 %v3071_v35 }
 0x846   :  { %2848 = vmatprep.subr.bf16.mxu0 %v3722_v0 }
 0x847   :  { %v3124_v11 = vpop.eup %3123 }
 0x848   :  { %v1061_v33 = vmul.f32 %v3124_v11, %v3120_v24  ;;  %v2650_v11 = vld [vmem:[#allocation16] ss:$0 sm:$0xff] }
 0x849   :  { %2849 = vmatpush3.bf16.msra.mxu0 %v3072_v36 }
 0x84a   :  { %v1063_v34 = vpack.c.bf16 %v1061_v33, %v1061_v33  ;;  %2850 = vmatprep.subr.bf16.mxu0 %v3722_v0 }
 0x84c   :  { %2843 = vmatmul.mubr.msk.bf16.vlgmr.msra.gmra.mrb[20].mxu1 %vm820_vm5, %v1063_v34 }
 0x84d   :  { %2866 = vmatprep.mubr.msk.bf16.mxu1 %vm3723_vm0, %v3722_v0  ;;  %2851 = vmatpush3.bf16.msra.mxu0 %v3073_v37  ;;  %v3079_v37 = vld [vmem:[#allocation19] sm:$0xff]  }
 0x84e   :  { %2852 = vmatprep.subr.bf16.mxu0 %v3722_v0  ;;  %2859 = vmatpush3.bf16.msra.mxu1 %v3075_v17  ;;  %v3090_v17 = vld [vmem:[%s4372_s1 + $0x30] ss:$8 sps:$4 sm:$0xff]  }
 0x84f   :  { %2860 = vmatprep.subr.bf16.mxu1 %v3722_v0 }
 0x851   :  { %2853 = vmatpush3.bf16.msra.mxu0 %v3074_v38  ;;  %v3080_v38 = vld [vmem:[#allocation19 + $0x8] sm:$0xff]  }
 0x852   :  { %2870 = vmatprep.subr.bf16.mxu0 %v3722_v0  ;;  %2861 = vmatpush3.bf16.msra.mxu1 %v3076_v18  ;;  %v3092_v18 = vld [vmem:[%s4372_s1 + $0x34] ss:$8 sps:$4 sm:$0xff]  }
 0x853   :  { %2862 = vmatprep.subr.bf16.mxu1 %v3722_v0 }
 0x856   :  { %2863 = vmatpush3.bf16.msra.mxu1 %v3077_v19 }
 0x857   :  { %2864 = vmatprep.subr.bf16.mxu1 %v3722_v0 }
 0x85a   :  { %2865 = vmatpush3.bf16.msra.mxu1 %v3078_v20 }
 0x917   :  { %v1107_v39 = vpop.f32.mrb[16].mxu0 }
 0x918   :  { %v2838_v40 = vpop.f32.mrb[17].mxu0 }
 0x919   :  { %v1110_v42 = vpop.f32.mrb[18].mxu0 }
 0x91a   :  { %v2839_v43 = vpop.f32.mrb[19].mxu0 }
 0x91f   :  { %v1156_v44 = vpop.f32.mrb[20].mxu1 }
 0x920   :  { %v3044_v45 = vpack.i.bf16 %v1156_v44, %v1107_v39  ;;  %v2844_v46 = vpop.f32.mrb[21].mxu1  ;;  %v2651_v39 = vld [vmem:[#allocation17] ss:$0 sm:$0xff] }
 0x921   :  { %v1159_v47 = vpop.f32.mrb[22].mxu1 }
 0x922   :  { %v2845_v49 = vpop.f32.mrb[23].mxu1  ;;  %3045 = vrot.lane.b32.xlu0 %v3044_v45, %s3726_s3 }
 0x994   :  { %v3046_v50 = vpop.permute.xlu0 %3045 }
 0x995   :  { %v3048_v52 = vunpack.i.h.bf16 %v3046_v50  ;;  %v3047_v55 = vunpack.i.l.bf16 %v3046_v50 }
 0x997   :  { %v1171_v56 = vsel %vm424_vm1, %v4115_v58, %v3048_v52  ;;  %v1170_v57 = vsel %vm424_vm1, %v4113_v53, %v3047_v55 }
 0x998   :  { %v1172_v59 = vpack.c.bf16 %v1171_v56, %v1170_v57 }
 0x99a   :  { %2855 = vmatmul.mubr.msk.bf16.vlgmr.msra.gmra.mrb[20].mxu0 %vm669_vm3, %v1172_v59 }
 0x99b   :  { %2874 = vmatprep.mubr.msk.bf16.mxu0 %vm3723_vm0, %v3722_v0  ;;  %2871 = vmatpush3.bf16.msra.mxu0 %v3079_v37 }
 0x99c   :  { %2872 = vmatprep.subr.bf16.mxu0 %v3722_v0 }
 0x99f   :  { %2873 = vmatpush3.bf16.msra.mxu0 %v3080_v38 }
 0x9a0   :  { %2878 = vmatprep.subr.bf16.mxu0 %v3722_v0 }
 0xa6d   :  { %v1249_v61 = vpop.f32.mrb[20].mxu0 }
 0xa6e   :  { %v1250_v62 = vadd.f32 %v2643_v60, %v1249_v61  ;;  %v2856_v63 = vpop.f32.mrb[21].mxu0 }
 0xa6f   :  { %v1252_v1 = vpop.f32.mrb[22].mxu0 }
 0xa70   :  { %v1253_v3 = vadd.f32 %v2643_v60, %v1252_v1  ;;  %v2857_v4 = vpop.f32.mrb[23].mxu0  ;;  %v1258_v6 = vadd.f32 %v1250_v62, %v4053_v48 }
 0xa72   :  { %v1260_v58 = vsel %vm669_vm3, %v1258_v6, 0.0  ;;  %v1259_v7 = vadd.f32 %v1253_v3, %v4056_v51 }
 0xa73   :  { %1261 = vadd.xlane.f32.xlu1 %v1260_v58 }
 0xa74   :  { %v1263_v53 = vsel %vm669_vm3, %v1259_v7, 0.0 }
 0xa75   :  { %1264 = vadd.xlane.f32.xlu0 %v1263_v53 }
 0xb00   :  { %v1262_v8 = vpop.xlane.xlu1 %1261 }
 0xb01   :  { %v1267_v9 = vmul.f32 0.015625, %v1262_v8 }
 0xb02   :  { %v1265_v10 = vpop.xlane.xlu0 %1264 }
 0xb03   :  { %v1269_v12 = vsub.f32 %v1258_v6, %v1267_v9  ;;  %v1268_v13 = vmul.f32 0.015625, %v1265_v10 }
 0xb05   :  { %v1270_v14 = vsub.f32 %v1259_v7, %v1268_v13  ;;  %v1271_v15 = vmul.f32 %v1269_v12, %v1269_v12  ;;  %v3083_v13 = vld [vmem:[%s4372_s1 + $0x4] ss:$8 sps:$4 sm:$0xff]  }
 0xb06   :  { %1567 = vmatprep.subr.bf16.mxu1 %v3083_v13 }
 0xb07   :  { %v1273_v48 = vsel %vm669_vm3, %v1271_v15, 0.0  ;;  %v1272_v16 = vmul.f32 %v1270_v14, %v1270_v14  ;;  %v3086_v15 = vld [vmem:[%s4372_s1 + $0x14] ss:$8 sps:$4 sm:$0xff]  }
 0xb08   :  { %1274 = vadd.xlane.f32.xlu1 %v1273_v48  ;;  %v3084_v48 = vld [vmem:[%s4372_s1 + $0x10] ss:$8 sps:$4 sm:$0xff]  }
 0xb09   :  { %v1276_v51 = vsel %vm669_vm3, %v1272_v16, 0.0  ;;  %v3089_v16 = vld [vmem:[%s4372_s1 + $0x24] ss:$8 sps:$4 sm:$0xff]  }
 0xb0c   :  { %1277 = vadd.xlane.f32.xlu1 %v1276_v51  ;;  %v3087_v51 = vld [vmem:[%s4372_s1 + $0x20] ss:$8 sps:$4 sm:$0xff]  }
 0xb95   :  { %v1275_v21 = vpop.xlane.xlu1 %1274 }
 0xb96   :  { %v1279_v22 = vmul.f32 0.015625, %v1275_v21 }
 0xb98   :  { %v1281_v23 = vadd.f32 1e-05, %v1279_v22 }
 0xb99   :  { %v1278_v24 = vpop.xlane.xlu1 %1277 }
 0xb9a   :  { %3125 = vrsqrt.f32 %v1281_v23  ;;  %v1280_v2 = vmul.f32 0.015625, %v1278_v24 }
 0xb9c   :  { %v1282_v25 = vadd.f32 1e-05, %v1280_v2 }
 0xb9e   :  { %3127 = vrsqrt.f32 %v1282_v25 }
 0xba4   :  { %v3126_v26 = vpop.eup %3125 }
 0xba5   :  { %v1285_v27 = vmul.f32 %v3126_v26, %v1269_v12  ;;  %v2661_v26 = vld [vmem:[#allocation22] ss:$0 sm:$0xff] }
 0xba7   :  { %v1293_v31 = vmul.f32 %v2649_v28, %v1285_v27 }
 0xba8   :  { %v3128_v30 = vpop.eup %3127 }
 0xba9   :  { %v1286_v32 = vmul.f32 %v3128_v30, %v1270_v14  ;;  %v1301_v34 = vadd.f32 %v2650_v11, %v1293_v31  ;;  %v3081_v14 = vld [vmem:[%s4372_s1] ss:$8 sps:$4 sm:$0xff]  }
 0xbaa   :  { %v2662_v31 = vld [vmem:[%s4373_s2] ss:$0 sm:$0xff] }
 0xbab   :  { %v1294_v33 = vmul.f32 %v2649_v28, %v1286_v32 }
 0xbad   :  { %v1302_v35 = vadd.f32 %v2650_v11, %v1294_v33 }
 0xbaf   :  { %v1303_v36 = vpack.c.bf16 %v1302_v35, %v1301_v34 }
 0xbb1   :  { %2867 = vmatmul.mubr.msk.bf16.vlgmr.msra.gmra.mrb[24].mxu1 %vm669_vm3, %v1303_v36 }
 0xbb2   :  { %1599 = vmatprep.mubr.bf16.mxu1 %v3725_v29  ;;  %v2657_v29 = vld [vmem:[#allocation20] ss:$0 sm:$0xff]  ;;  %1568 = vmatpush1.bf16.msra.mxu1 %v3081_v14 }
 0xbb3   :  { %1569 = vmatprep.subr.bf16.mxu1 %v3086_v15 }
 0xbb6   :  { %1570 = vmatpush1.bf16.msra.mxu1 %v3084_v48 }
 0xbb7   :  { %1571 = vmatprep.subr.bf16.mxu1 %v3089_v16 }
 0xbba   :  { %1572 = vmatpush1.bf16.msra.mxu1 %v3087_v51 }
 0xbbb   :  { %1573 = vmatprep.subr.bf16.mxu1 %v3092_v18 }
 0xbbe   :  { %1574 = vmatpush1.bf16.msra.mxu1 %v3090_v17 }
 0xbbf   :  { %2890 = vmatprep.subr.bf16.mxu1 %v3722_v0 }
 0xc84   :  { %v1380_v40 = vpop.f32.mrb[24].mxu1 }
 0xc85   :  { %v1381_v42 = vadd.f32 %v2651_v39, %v1380_v40  ;;  %v2868_v43 = vpop.f32.mrb[25].mxu1 }
 0xc86   :  { %v1383_v44 = vpop.f32.mrb[26].mxu1 }
 0xc87   :  { %v1384_v45 = vadd.f32 %v2651_v39, %v1383_v44  ;;  %v2869_v46 = vpop.f32.mrb[27].mxu1  ;;  %v1387_v47 = vmax.f32 %v1381_v42, 0.0 }
 0xc89   :  { %v1388_v49 = vmax.f32 %v1384_v45, 0.0 }
 0xc8b   :  { %v1389_v50 = vpack.c.bf16 %v1388_v49, %v1387_v47 }
 0xc8d   :  { %2875 = vmatmul.mubr.msk.bf16.vlgmr.msra.gmra.mrb[24].mxu0 %vm424_vm1, %v1389_v50 }
 0xc8e   :  { %2880 = vmatprep.mubr.msk.bf16.mxu0 %vm3723_vm0, %v3722_v0 }
 0xd60   :  { %v1450_v52 = vpop.f32.mrb[24].mxu0 }
 0xd61   :  { %v1451_v55 = vadd.f32 %v2657_v29, %v1450_v52  ;;  %v2876_v56 = vpop.f32.mrb[25].mxu0 }
 0xd62   :  { %v1453_v57 = vpop.f32.mrb[26].mxu0 }
 0xd63   :  { %v1454_v59 = vadd.f32 %v2657_v29, %v1453_v57  ;;  %v2877_v60 = vpop.f32.mrb[27].mxu0  ;;  %v1459_v61 = vadd.f32 %v1451_v55, %v1301_v34 }
 0xd65   :  { %v1461_v62 = vsel %vm669_vm3, %v1459_v61, 0.0  ;;  %v1460_v63 = vadd.f32 %v1454_v59, %v1302_v35  ;;  %v1512_v35 = vld [vmem:[#allocation23] sm:$0x3] }
 0xd66   :  { %1462 = vadd.xlane.f32.xlu1 %v1461_v62  ;;  %v1517_v36 = vrot.slane %v1512_v35, %v4050_v41  ;;  %v1521_v37 = vrot.slane %v1512_v35, %v625_v54 }
 0xd67   :  { %v1464_v1 = vsel %vm669_vm3, %v1460_v63, 0.0 }
 0xd6a   :  { %1465 = vadd.xlane.f32.xlu1 %v1464_v1 }
 0xdf3   :  { %v1463_v3 = vpop.xlane.xlu1 %1462 }
 0xdf4   :  { %v1467_v4 = vmul.f32 0.015625, %v1463_v3 }
 0xdf6   :  { %v1469_v6 = vsub.f32 %v1459_v61, %v1467_v4 }
 0xdf7   :  { %v1466_v58 = vpop.xlane.xlu1 %1465 }
 0xdf8   :  { %v1468_v7 = vmul.f32 0.015625, %v1466_v58  ;;  %v1471_v53 = vmul.f32 %v1469_v6, %v1469_v6 }
 0xdfa   :  { %v1470_v8 = vsub.f32 %v1460_v63, %v1468_v7  ;;  %v1473_v9 = vsel %vm669_vm3, %v1471_v53, 0.0 }
 0xdfb   :  { %1474 = vadd.xlane.f32.xlu1 %v1473_v9 }
 0xdfc   :  { %v1472_v10 = vmul.f32 %v1470_v8, %v1470_v8 }
 0xdfe   :  { %v1476_v12 = vsel %vm669_vm3, %v1472_v10, 0.0 }
 0xdff   :  { %1477 = vadd.xlane.f32.xlu1 %v1476_v12 }
 0xe88   :  { %v1475_v19 = vpop.xlane.xlu1 %1474 }
 0xe89   :  { %v1479_v20 = vmul.f32 0.015625, %v1475_v19 }
 0xe8b   :  { %v1481_v21 = vadd.f32 1e-05, %v1479_v20 }
 0xe8c   :  { %v1478_v22 = vpop.xlane.xlu1 %1477 }
 0xe8d   :  { %3129 = vrsqrt.f32 %v1481_v21  ;;  %v1480_v23 = vmul.f32 0.015625, %v1478_v22 }
 0xe8f   :  { %v1482_v24 = vadd.f32 1e-05, %v1480_v23 }
 0xe91   :  { %3131 = vrsqrt.f32 %v1482_v24 }
 0xe97   :  { %v3130_v2 = vpop.eup %3129 }
 0xe98   :  { %v1485_v25 = vmul.f32 %v3130_v2, %v1469_v6 }
 0xe9a   :  { %v1493_v28 = vmul.f32 %v2661_v26, %v1485_v25 }
 0xe9b   :  { %v3132_v27 = vpop.eup %3131 }
 0xe9c   :  { %v1486_v30 = vmul.f32 %v3132_v27, %v1470_v8  ;;  %v4185_v11 = vadd.f32 %v2662_v31, %v1493_v28 }
 0xe9e   :  { %v1494_v32 = vmul.f32 %v2661_v26, %v1486_v30 }
 0xea0   :  { %v4187_v33 = vadd.f32 %v2662_v31, %v1494_v32 }
 0xea2   :  { %v1503_v34 = vpack.c.bf16 %v4187_v33, %v4185_v11 }
 0xea4   :  { %2671 = vmatmul.mubr.msk.bf16.vlgmr.msra.gmra.mrb[28].mxu1 %vm669_vm3, %v1503_v34 }
 0xea5   :  { %2892 = vmatprep.mubr.msk.bf16.mxu1 %vm3723_vm0, %v3722_v0 }
 0xf77   :  { %v1601_v38 = vpop.f32.mrb[28].mxu1 }
 0xf78   :  { %v1602_v39 = vadd.f32 %v1601_v38, %v1517_v36  ;;  %v1603_v40 = vpop.f32.mrb[29].mxu1 }
 0xf79   :  { %v1604_v42 = vadd.f32 %v1603_v40, %v1521_v37  ;;  %v1605_v43 = vpop.f32.mrb[30].mxu1 }
 0xf7a   :  { %v1610_v44 = vpack.c.bf16 %v1602_v39, %v1602_v39  ;;  %v1606_v45 = vadd.f32 %v1605_v43, %v1517_v36  ;;  %v1607_v46 = vpop.f32.mrb[31].mxu1 }
 0xf7b   :  { %v4197_v47 = vpack.c.bf16 %v1604_v42, %v1604_v42  ;;  %v1608_v49 = vadd.f32 %v1607_v46, %v1521_v37 }
 0xf7c   :  { %v1611_v50 = vpack.c.bf16 %v1606_v45, %v1606_v45  ;;  %1615 = vrot.lane.b32.xlu1 %v1610_v44, %s3701_s26 }
 0xf7d   :  { %v1742_v41 = vsel %vm848_vm4, %v4197_v47, 0  ;;  %v4211_v55 = vpack.c.bf16 %v1608_v49, %v1608_v49 }
 0xf7e   :  { %1664 = vrot.lane.b32.xlu0 %v1611_v50, %s3701_s26  ;;  %2891 = vmatpush3.bf16.msra.mxu1 %v1742_v41  ;;  %s4374_s26 = sld [smem:[#allocation57_spill]] }
 0xf7f   :  { %2902 = vmatprep.subr.bf16.mxu1 %v3722_v0  ;;  %v1788_v56 = vsel %vm848_vm4, %v4211_v55, 0 }
 0xfee   :  { %v1616_v5 = vpop.permute.xlu1 %1615 }
 0xfef   :  { %v1621_v54 = vsel %vm424_vm1, %v1616_v5, 0 }
 0xff0   :  { %2879 = vmatpush3.bf16.xpose.msra.mxu0 %v1621_v54  ;;  %v1665_v29 = vpop.permute.xlu0 %1664 }
 0xff1   :  { %2884 = vmatprep.subr.bf16.mxu0 %v3722_v0  ;;  %v1670_v52 = vsel %vm424_vm1, %v1665_v29, 0 }
 0xff7   :  { %2881 = vmatmul.mubr.msk.bf16.vlgmr.msra.gmra.mrb[28].mxu0 %vm424_vm1, %v1610_v44 }
 0xff8   :  { %2885 = vmatpush3.bf16.xpose.msra.mxu0 %v1670_v52  ;;  %2886 = vmatprep.mubr.msk.bf16.mxu0 %vm3723_vm0, %v3722_v0 }
 0xff9   :  { %2896 = vmatprep.subr.bf16.mxu0 %v3722_v0 }
 0xfff   :  { %2887 = vmatmul.mubr.msk.bf16.vlgmr.msra.gmra.mrb[32].mxu0 %vm424_vm1, %v1611_v50 }
0x1000   :  { %2897 = vmatpush3.bf16.msra.mxu0 %v1788_v56  ;;  %2898 = vmatprep.mubr.msk.bf16.mxu0 %vm3723_vm0, %v3722_v0 }
0x1001   :  { %2908 = vmatprep.subr.bf16.mxu0 %v3722_v0 }
0x10ca   :  { %v1657_v57 = vpop.f32.mrb[28].mxu0 }
0x10cb   :  { %v1712_v59 = vmul.f32 0.17677669, %v1657_v57  ;;  %v2882_v60 = vpop.f32.mrb[29].mxu0 }
0x10cc   :  { %v1660_v61 = vpop.f32.mrb[30].mxu0 }
0x10cd   :  { %v2883_v62 = vpop.f32.mrb[31].mxu0  ;;  %v1714_v63 = vsel %vm820_vm5, %v1712_v59, -inf }
0x10ce   :  { %1715 = vmax.xlane.f32.xlu1 %v1714_v63 }
0x10d2   :  { %v1706_v1 = vpop.f32.mrb[32].mxu0 }
0x10d3   :  { %v1713_v3 = vmul.f32 0.17677669, %v1706_v1  ;;  %v2888_v4 = vpop.f32.mrb[33].mxu0 }
0x10d4   :  { %v1709_v6 = vpop.f32.mrb[34].mxu0 }
0x10d5   :  { %v2889_v58 = vpop.f32.mrb[35].mxu0  ;;  %v1717_v7 = vsel %vm820_vm5, %v1713_v3, -inf }
0x10d6   :  { %1718 = vmax.xlane.f32.xlu0 %v1717_v7 }
0x10ec   :  { %1832 = vrot.lane.b32.xlu0 %v1610_v44, %s3726_s3 }
0x10f0   :  { %1880 = vrot.lane.b32.xlu0 %v1611_v50, %s3727_s23 }
0x115b   :  { %v1716_v53 = vpop.xlane.xlu1 %1715 }
0x115c   :  { %v1720_v8 = vsub.f32 %v1712_v59, %v1716_v53 }
0x115e   :  { %v1722_v9 = vmul.f32 1.442695, %v1720_v8 }
0x1160   :  { %3133 = vpow2.f32 %v1722_v9 }
0x1163   :  { %v1719_v10 = vpop.xlane.xlu0 %1718 }
0x1164   :  { %v1721_v12 = vsub.f32 %v1713_v3, %v1719_v10 }
0x1166   :  { %v1724_v13 = vmul.f32 1.442695, %v1721_v12 }
0x1167   :  { %v1833_v20 = vpop.permute.xlu0 %1832 }
0x1168   :  { %3135 = vpow2.f32 %v1724_v13  ;;  %v1838_v22 = vsel %vm424_vm1, %v1833_v20, 0  ;;  %v3093_v13 = vld [vmem:[%s4374_s26] sm:$0xff]  }
0x116a   :  { %v3134_v14 = vpop.eup %3133 }
0x116b   :  { %v1726_v15 = vsel %vm820_vm5, %v3134_v14, 0.0  ;;  %v1881_v28 = vpop.permute.xlu0 %1880 }
0x116c   :  { %1727 = vadd.xlane.f32.xlu1 %v1726_v15  ;;  %v3095_v15 = vld [vmem:[%s4374_s26 + $0x10] sm:$0xff]  }
0x1172   :  { %v3136_v48 = vpop.eup %3135 }
0x1173   :  { %v1729_v16 = vsel %vm820_vm5, %v3136_v48, 0.0 }
0x1174   :  { %1730 = vadd.xlane.f32.xlu1 %v1729_v16 }
0x1185   :  { %1882 = vrot.lane.b32.xlu1 %v1611_v50, %s3726_s3 }
0x1189   :  { %1830 = vrot.lane.b32.xlu1 %v1610_v44, %s3727_s23 }
0x11f9   :  { %v1728_v51 = vpop.xlane.xlu1 %1727 }
0x11fa   :  { %3137 = vrcp.f32 %v1728_v51 }
0x1201   :  { %v1731_v17 = vpop.xlane.xlu1 %1730 }
0x1202   :  { %3139 = vrcp.f32 %v1731_v17 }
0x1204   :  { %v3138_v18 = vpop.eup %3137 }
0x1205   :  { %v1734_v19 = vmul.f32 %v3138_v18, %v3134_v14  ;;  %v1883_v23 = vpop.permute.xlu1 %1882  ;;  %v3094_v14 = vld [vmem:[%s4374_s26 + $0x8] sm:$0xff]  }
0x1206   :  { %v1888_v27 = vsel %vm424_vm1, %v1883_v23, 0 }
0x1207   :  { %v1736_v21 = vpack.c.bf16 %v1734_v19, %v1734_v19 }
0x1209   :  { %2893 = vmatmul.mubr.msk.bf16.vlgmr.msra.gmra.mrb[32].mxu1 %vm820_vm5, %v1736_v21  ;;  %v1831_v26 = vpop.permute.xlu1 %1830 }
0x120a   :  { %2903 = vmatpush3.bf16.xpose.msra.mxu1 %v1838_v22  ;;  %2904 = vmatprep.mubr.msk.bf16.mxu1 %vm3723_vm0, %v3722_v0 }
0x120b   :  { %2914 = vmatprep.subr.bf16.mxu1 %v3722_v0 }
0x120c   :  { %v3140_v24 = vpop.eup %3139 }
0x120d   :  { %v1735_v2 = vmul.f32 %v3140_v24, %v3136_v48  ;;  %v3096_v48 = vld [vmem:[%s4374_s26 + $0x18] sm:$0xff]  }
0x120f   :  { %v1737_v25 = vpack.c.bf16 %v1735_v2, %v1735_v2 }
0x1211   :  { %2899 = vmatmul.mubr.msk.bf16.vlgmr.msra.gmra.mrb[36].mxu0 %vm820_vm5, %v1737_v25  ;;  %2905 = vmatmul.mubr.msk.bf16.vlgmr.msra.gmra.mrb[36].mxu1 %vm424_vm1, %v1831_v26 }
0x1212   :  { %2909 = vmatpush3.bf16.xpose.msra.mxu0 %v1888_v27  ;;  %2910 = vmatprep.mubr.msk.bf16.mxu0 %vm3723_vm0, %v3722_v0 }
0x1213   :  { %2920 = vmatprep.subr.bf16.mxu0 %v3722_v0  ;;  %2916 = vmatprep.mubr.msk.bf16.mxu1 %vm3723_vm0, %v3722_v0 }
0x1219   :  { %2911 = vmatmul.mubr.msk.bf16.vlgmr.msra.gmra.mrb[40].mxu0 %vm424_vm1, %v1881_v28 }
0x121a   :  { %2922 = vmatprep.mubr.msk.bf16.mxu0 %vm3723_vm0, %v3722_v0 }
0x12dc   :  { %v4243_v30 = vpop.f32.mrb[32].mxu1 }
0x12dd   :  { %v2894_v31 = vpop.f32.mrb[33].mxu1 }
0x12de   :  { %v1781_v32 = vpop.f32.mrb[34].mxu1  ;;  %v2680_v31 = vld [vmem:[#allocation25] ss:$0 sm:$0xff] }
0x12df   :  { %v2895_v34 = vpop.f32.mrb[35].mxu1 }
0x12e4   :  { %v4245_v35 = vpop.f32.mrb[36].mxu0  ;;  %v1874_v36 = vpop.f32.mrb[36].mxu1 }
0x12e5   :  { %v1930_v37 = vmul.f32 0.17677669, %v1874_v36  ;;  %v2900_v38 = vpop.f32.mrb[37].mxu0  ;;  %v2906_v39 = vpop.f32.mrb[37].mxu1 }
0x12e6   :  { %v1827_v40 = vpop.f32.mrb[38].mxu0  ;;  %v1877_v42 = vpop.f32.mrb[38].mxu1 }
0x12e7   :  { %v2901_v43 = vpop.f32.mrb[39].mxu0  ;;  %v2907_v44 = vpop.f32.mrb[39].mxu1  ;;  %v1932_v45 = vsel %vm820_vm5, %v1930_v37, -inf }
0x12e8   :  { %1933 = vmax.xlane.f32.xlu1 %v1932_v45 }
0x12ec   :  { %v1924_v46 = vpop.f32.mrb[40].mxu0 }
0x12ed   :  { %v1931_v49 = vmul.f32 0.17677669, %v1924_v46  ;;  %v2912_v50 = vpop.f32.mrb[41].mxu0 }
0x12ee   :  { %v1927_v41 = vpop.f32.mrb[42].mxu0 }
0x12ef   :  { %v2913_v5 = vpop.f32.mrb[43].mxu0  ;;  %v1935_v54 = vsel %vm820_vm5, %v1931_v49, -inf }
0x12f0   :  { %1936 = vmax.xlane.f32.xlu0 %v1935_v54  ;;  %v3097_v54 = vld [vmem:[%s4375_s17] sm:$0xff]  }
0x1375   :  { %v1934_v29 = vpop.xlane.xlu1 %1933 }
0x1376   :  { %v1938_v52 = vsub.f32 %v1930_v37, %v1934_v29  ;;  %v3098_v29 = vld [vmem:[%s4375_s17 + $0x8] sm:$0xff]  }
0x1378   :  { %v1940_v56 = vmul.f32 1.442695, %v1938_v52  ;;  %v3099_v52 = vld [vmem:[%s4375_s17 + $0x10] sm:$0xff]  }
0x137a   :  { %3141 = vpow2.f32 %v1940_v56  ;;  %v3100_v56 = vld [vmem:[%s4375_s17 + $0x18] sm:$0xff]  }
0x137d   :  { %v1937_v57 = vpop.xlane.xlu0 %1936 }
0x137e   :  { %v1939_v59 = vsub.f32 %v1931_v49, %v1937_v57 }
0x1380   :  { %v1942_v60 = vmul.f32 1.442695, %v1939_v59 }
0x1382   :  { %3143 = vpow2.f32 %v1942_v60 }
0x1384   :  { %v3142_v61 = vpop.eup %3141 }
0x1385   :  { %v1944_v62 = vsel %vm820_vm5, %v3142_v61, 0.0 }
0x1386   :  { %1945 = vadd.xlane.f32.xlu0 %v1944_v62 }
0x138c   :  { %v3144_v63 = vpop.eup %3143 }
0x138d   :  { %v1947_v1 = vsel %vm820_vm5, %v3144_v63, 0.0 }
0x138e   :  { %1948 = vadd.xlane.f32.xlu1 %v1947_v1 }
0x139c   :  { %1957 = vrot.lane.b32.xlu0 %v4197_v47, %s3727_s23 }
0x139f   :  { %2006 = vrot.lane.b32.xlu1 %v4211_v55, %s3727_s23 }
0x1413   :  { %v1946_v3 = vpop.xlane.xlu0 %1945 }
0x1414   :  { %3145 = vrcp.f32 %v1946_v3 }
0x1417   :  { %v1958_v4 = vpop.permute.xlu0 %1957 }
0x1418   :  { %v1963_v6 = vsel %vm848_vm4, %v1958_v4, 0  ;;  %v2686_v4 = vld [vmem:[#allocation26] ss:$0 sm:$0xff] }
0x1419   :  { %2915 = vmatpush3.bf16.msra.mxu1 %v1963_v6 }
0x141a   :  { %2926 = vmatprep.subr.bf16.mxu1 %v3722_v0 }
0x141b   :  { %v1949_v58 = vpop.xlane.xlu1 %1948 }
0x141c   :  { %3147 = vrcp.f32 %v1949_v58 }
0x141e   :  { %v3146_v7 = vpop.eup %3145 }
0x141f   :  { %v1952_v53 = vmul.f32 %v3146_v7, %v3142_v61  ;;  %v2007_v8 = vpop.permute.xlu1 %2006 }
0x1420   :  { %v2012_v47 = vsel %vm848_vm4, %v2007_v8, 0 }
0x1421   :  { %2921 = vmatpush3.bf16.msra.mxu0 %v2012_v47  ;;  %v1954_v55 = vpack.c.bf16 %v1952_v53, %v1952_v53  ;;  %v2687_v53 = vld [vmem:[#allocation28] ss:$0 sm:$0xff] }
0x1422   :  { %2938 = vmatprep.subr.bf16.mxu0 %v3722_v0 }
0x1423   :  { %2917 = vmatmul.mubr.msk.bf16.vlgmr.msra.gmra.mrb[40].mxu1 %vm820_vm5, %v1954_v55 }
0x1424   :  { %2934 = vmatprep.mubr.msk.bf16.mxu1 %vm3723_vm0, %v3722_v0  ;;  %2927 = vmatpush3.bf16.msra.mxu1 %v3093_v13  ;;  %v2688_v13 = vld [vmem:[#allocation29] ss:$0 sm:$0xff] }
0x1425   :  { %2928 = vmatprep.subr.bf16.mxu1 %v3722_v0 }
0x1426   :  { %v3148_v9 = vpop.eup %3147 }
0x1427   :  { %v1953_v10 = vmul.f32 %v3148_v9, %v3144_v63 }
0x1428   :  { %2929 = vmatpush3.bf16.msra.mxu1 %v3094_v14 }
0x1429   :  { %v1955_v12 = vpack.c.bf16 %v1953_v10, %v1953_v10  ;;  %2930 = vmatprep.subr.bf16.mxu1 %v3722_v0  ;;  %v3101_v10 = vld [vmem:[%s4376_s13] sm:$0xff]  }
0x142b   :  { %2923 = vmatmul.mubr.msk.bf16.vlgmr.msra.gmra.mrb[44].mxu0 %vm820_vm5, %v1955_v12  ;;  %v3102_v12 = vld [vmem:[%s4376_s13 + $0x8] sm:$0xff]  }
0x142c   :  { %2946 = vmatprep.mubr.msk.bf16.mxu0 %vm3723_vm0, %v3722_v0  ;;  %2931 = vmatpush3.bf16.msra.mxu1 %v3095_v15 }
0x142d   :  { %2932 = vmatprep.subr.bf16.mxu1 %v3722_v0  ;;  %2939 = vmatpush3.bf16.msra.mxu0 %v3097_v54 }
0x142e   :  { %2940 = vmatprep.subr.bf16.mxu0 %v3722_v0 }
0x1430   :  { %2933 = vmatpush3.bf16.msra.mxu1 %v3096_v48 }
0x1431   :  { %2950 = vmatprep.subr.bf16.mxu1 %v3722_v0  ;;  %2941 = vmatpush3.bf16.msra.mxu0 %v3098_v29 }
0x1432   :  { %2942 = vmatprep.subr.bf16.mxu0 %v3722_v0 }
0x1435   :  { %2943 = vmatpush3.bf16.msra.mxu0 %v3099_v52  ;;  %v2698_v52 = vld [vmem:[#allocation32] ss:$0 sm:$0xff] }
0x1436   :  { %2944 = vmatprep.subr.bf16.mxu0 %v3722_v0 }
0x1439   :  { %2945 = vmatpush3.bf16.msra.mxu0 %v3100_v56 }
0x143a   :  { %2958 = vmatprep.subr.bf16.mxu0 %v3722_v0 }
0x14f6   :  { %v1999_v16 = vpop.f32.mrb[40].mxu1 }
0x14f7   :  { %v2918_v51 = vpop.f32.mrb[41].mxu1 }
0x14f8   :  { %v2002_v17 = vpop.f32.mrb[42].mxu1 }
0x14f9   :  { %v2919_v18 = vpop.f32.mrb[43].mxu1 }
0x14fe   :  { %v2048_v19 = vpop.f32.mrb[44].mxu0 }
0x14ff   :  { %v3049_v20 = vpack.i.bf16 %v2048_v19, %v1999_v16  ;;  %v2924_v21 = vpop.f32.mrb[45].mxu0 }
0x1500   :  { %v2051_v22 = vpop.f32.mrb[46].mxu0  ;;  %v2694_v21 = vld [vmem:[#allocation31] ss:$0 sm:$0xff] }
0x1501   :  { %3050 = vrot.lane.b32.xlu1 %v3049_v20, %s3726_s3  ;;  %v2925_v23 = vpop.f32.mrb[47].mxu0 }
0x1573   :  { %v3051_v24 = vpop.permute.xlu1 %3050 }
0x1574   :  { %v3053_v2 = vunpack.i.h.bf16 %v3051_v24  ;;  %v3052_v25 = vunpack.i.l.bf16 %v3051_v24 }
0x1576   :  { %v2063_v26 = vsel %vm424_vm1, %v4245_v35, %v3053_v2  ;;  %v2062_v27 = vsel %vm424_vm1, %v4243_v30, %v3052_v25 }
0x1577   :  { %v2064_v28 = vpack.c.bf16 %v2063_v26, %v2062_v27 }
0x1579   :  { %2935 = vmatmul.mubr.msk.bf16.vlgmr.msra.gmra.mrb[44].mxu1 %vm669_vm3, %v2064_v28 }
0x157a   :  { %2954 = vmatprep.mubr.msk.bf16.mxu1 %vm3723_vm0, %v3722_v0  ;;  %2951 = vmatpush3.bf16.msra.mxu1 %v3101_v10 }
0x157b   :  { %2952 = vmatprep.subr.bf16.mxu1 %v3722_v0 }
0x157e   :  { %2953 = vmatpush3.bf16.msra.mxu1 %v3102_v12 }
0x157f   :  { %2970 = vmatprep.subr.bf16.mxu1 %v3722_v0 }
0x164c   :  { %v2141_v32 = vpop.f32.mrb[44].mxu1 }
0x164d   :  { %v2142_v34 = vadd.f32 %v2680_v31, %v2141_v32  ;;  %v2936_v36 = vpop.f32.mrb[45].mxu1 }
0x164e   :  { %v2144_v37 = vpop.f32.mrb[46].mxu1 }
0x164f   :  { %v2145_v38 = vadd.f32 %v2680_v31, %v2144_v37  ;;  %v2937_v39 = vpop.f32.mrb[47].mxu1  ;;  %v2150_v40 = vadd.f32 %v2142_v34, %v4185_v11 }
0x1651   :  { %v2152_v35 = vsel %vm669_vm3, %v2150_v40, 0.0  ;;  %v2151_v42 = vadd.f32 %v2145_v38, %v4187_v33 }
0x1652   :  { %2153 = vadd.xlane.f32.xlu0 %v2152_v35 }
0x1653   :  { %v2155_v30 = vsel %vm669_vm3, %v2151_v42, 0.0 }
0x1654   :  { %2156 = vadd.xlane.f32.xlu1 %v2155_v30 }
0x16df   :  { %v2154_v43 = vpop.xlane.xlu0 %2153 }
0x16e0   :  { %v2158_v44 = vmul.f32 0.015625, %v2154_v43 }
0x16e1   :  { %v2157_v45 = vpop.xlane.xlu1 %2156 }
0x16e2   :  { %v2160_v46 = vsub.f32 %v2150_v40, %v2158_v44  ;;  %v2159_v49 = vmul.f32 0.015625, %v2157_v45  ;;  %v3103_v44 = vld [vmem:[%s4377_s7] sm:$0xff]   ;;  %v3104_v45 = vld [vmem:[%s4377_s7 + $0x8] sm:$0xff]  }
0x16e4   :  { %v2161_v50 = vsub.f32 %v2151_v42, %v2159_v49  ;;  %v2162_v41 = vmul.f32 %v2160_v46, %v2160_v46  ;;  %v3106_v49 = vld [vmem:[%s4377_s7 + $0x18] sm:$0xff]  }
0x16e6   :  { %v2164_v11 = vsel %vm669_vm3, %v2162_v41, 0.0  ;;  %v2163_v5 = vmul.f32 %v2161_v50, %v2161_v50 }
0x16e7   :  { %2165 = vadd.xlane.f32.xlu0 %v2164_v11 }
0x16e8   :  { %v2167_v33 = vsel %vm669_vm3, %v2163_v5, 0.0 }
0x16eb   :  { %2168 = vadd.xlane.f32.xlu0 %v2167_v33 }
0x1774   :  { %v2166_v57 = vpop.xlane.xlu0 %2165 }
0x1775   :  { %v2170_v59 = vmul.f32 0.015625, %v2166_v57 }
0x1777   :  { %v2172_v60 = vadd.f32 1e-05, %v2170_v59 }
0x1778   :  { %v2169_v61 = vpop.xlane.xlu0 %2168 }
0x1779   :  { %3149 = vrsqrt.f32 %v2172_v60  ;;  %v2171_v62 = vmul.f32 0.015625, %v2169_v61  ;;  %v2699_v61 = vld [vmem:[#allocation34] ss:$0 sm:$0xff] }
0x177b   :  { %v2173_v63 = vadd.f32 1e-05, %v2171_v62 }
0x177d   :  { %3151 = vrsqrt.f32 %v2173_v63 }
0x1783   :  { %v3150_v1 = vpop.eup %3149 }
0x1784   :  { %v2176_v3 = vmul.f32 %v3150_v1, %v2160_v46  ;;  %v3105_v46 = vld [vmem:[%s4377_s7 + $0x10] sm:$0xff]  }
0x1786   :  { %v2184_v58 = vmul.f32 %v2686_v4, %v2176_v3 }
0x1787   :  { %v3152_v6 = vpop.eup %3151 }
0x1788   :  { %v2177_v7 = vmul.f32 %v3152_v6, %v2161_v50  ;;  %v2192_v47 = vadd.f32 %v2687_v53, %v2184_v58  ;;  %v3108_v6 = vld [vmem:[%s3899_s24 + $0x8] sm:$0xff]   ;;  %v2700_v58 = vld [vmem:[%s3894_s9] ss:$0 sm:$0xff] }
0x178a   :  { %v2185_v8 = vmul.f32 %v2686_v4, %v2177_v7  ;;  %v3107_v4 = vld [vmem:[%s3899_s24] sm:$0xff]   ;;  %s3728_s24 = smov [#allocation35]  }
0x178b   :  { %s2559_s19 = sshll.u32 %s3728_s24, 4  ;;  %s2560_s19 = int_to_ptr.vmem [resolvable:$true] %s2559_s19 }
0x178c   :  { %v2193_v55 = vadd.f32 %v2687_v53, %v2185_v8  ;;  %s3619_s9 = scalar_lea.vmem %s2560_s19, 256  ;;  %p3624_p1 = scmp.lt.s32.totalorder %s2560_s19, %s2560_s19 }
0x178d   :  { %p3620_p0 = scmp.ne.s32.totalorder %s2560_s19, %s3619_s9  ;;  %p3625_p2 = scmp.lt.s32.totalorder %s3619_s9, %s3619_s9 }
0x178e   :  { %v2194_v9 = vpack.c.bf16 %v2193_v55, %v2192_v47 }
0x178f   :  { %p3626_p3 = por %p3625_p2, %p3624_p1 }
0x1790   :  { %2947 = vmatmul.mubr.msk.bf16.vlgmr.msra.gmra.mrb[48].mxu0 %vm669_vm3, %v2194_v9 }
0x1791   :  { %2966 = vmatprep.mubr.msk.bf16.mxu0 %vm3723_vm0, %v3722_v0  ;;  %2959 = vmatpush3.bf16.msra.mxu0 %v3103_v44  ;;  %p3627_p4 = pnand %p3626_p3, %p3620_p0 }
0x1792   :  { %2960 = vmatprep.subr.bf16.mxu0 %v3722_v0 }
0x1795   :  { %2961 = vmatpush3.bf16.msra.mxu0 %v3104_v45 }
0x1796   :  { %2962 = vmatprep.subr.bf16.mxu0 %v3722_v0 }
0x1799   :  { %2963 = vmatpush3.bf16.msra.mxu0 %v3105_v46 }
0x179a   :  { %2964 = vmatprep.subr.bf16.mxu0 %v3722_v0 }
0x179d   :  { %2965 = vmatpush3.bf16.msra.mxu0 %v3106_v49 }
0x1863   :  { %v2271_v14 = vpop.f32.mrb[48].mxu0 }
0x1864   :  { %v2272_v15 = vadd.f32 %v2688_v13, %v2271_v14  ;;  %v2948_v48 = vpop.f32.mrb[49].mxu0 }
0x1865   :  { %v2274_v16 = vpop.f32.mrb[50].mxu0 }
0x1866   :  { %v2275_v51 = vadd.f32 %v2688_v13, %v2274_v16  ;;  %v2949_v17 = vpop.f32.mrb[51].mxu0  ;;  %v2278_v18 = vmax.f32 %v2272_v15, 0.0 }
0x1868   :  { %v2279_v19 = vmax.f32 %v2275_v51, 0.0 }
0x186a   :  { %v2280_v20 = vpack.c.bf16 %v2279_v19, %v2278_v18 }
0x186c   :  { %2955 = vmatmul.mubr.msk.bf16.vlgmr.msra.gmra.mrb[48].mxu1 %vm424_vm1, %v2280_v20 }
0x186d   :  { %2974 = vmatprep.mubr.msk.bf16.mxu1 %vm3723_vm0, %v3722_v0  ;;  %2971 = vmatpush3.bf16.msra.mxu1 %v3107_v4 }
0x186e   :  { %2972 = vmatprep.subr.bf16.mxu1 %v3722_v0  ;;  %v2706_v0 = vld [vmem:[%s3904_s12] ss:$0 sm:$0xff] }
0x1871   :  { %2973 = vmatpush3.bf16.msra.mxu1 %v3108_v6 }
0x193f   :  { %v2341_v22 = vpop.f32.mrb[48].mxu1 }
0x1940   :  { %v2342_v23 = vadd.f32 %v2694_v21, %v2341_v22  ;;  %v2956_v24 = vpop.f32.mrb[49].mxu1 }
0x1941   :  { %v2344_v2 = vpop.f32.mrb[50].mxu1 }
0x1942   :  { %v2345_v25 = vadd.f32 %v2694_v21, %v2344_v2  ;;  %v2957_v26 = vpop.f32.mrb[51].mxu1  ;;  %v2350_v27 = vadd.f32 %v2342_v23, %v2192_v47 }
0x1944   :  { %v2352_v28 = vsel %vm669_vm3, %v2350_v27, 0.0  ;;  %v2351_v31 = vadd.f32 %v2345_v25, %v2193_v55 }
0x1945   :  { %2353 = vadd.xlane.f32.xlu1 %v2352_v28 }
0x1946   :  { %v2355_v32 = vsel %vm669_vm3, %v2351_v31, 0.0 }
0x1947   :  { %2356 = vadd.xlane.f32.xlu0 %v2355_v32 }
0x19d2   :  { %v2354_v34 = vpop.xlane.xlu1 %2353 }
0x19d3   :  { %v2358_v36 = vmul.f32 0.015625, %v2354_v34 }
0x19d4   :  { %v2357_v37 = vpop.xlane.xlu0 %2356 }
0x19d5   :  { %v2360_v38 = vsub.f32 %v2350_v27, %v2358_v36  ;;  %v2359_v39 = vmul.f32 0.015625, %v2357_v37 }
0x19d7   :  { %v2361_v40 = vsub.f32 %v2351_v31, %v2359_v39  ;;  %v2362_v35 = vmul.f32 %v2360_v38, %v2360_v38 }
0x19d9   :  { %v2364_v42 = vsel %vm669_vm3, %v2362_v35, 0.0  ;;  %v2363_v30 = vmul.f32 %v2361_v40, %v2361_v40 }
0x19da   :  { %2365 = vadd.xlane.f32.xlu1 %v2364_v42 }
0x19db   :  { %v2367_v43 = vsel %vm669_vm3, %v2363_v30, 0.0 }
0x19dc   :  { %2368 = vadd.xlane.f32.xlu0 %v2367_v43 }
0x1a67   :  { %v2366_v50 = vpop.xlane.xlu1 %2365 }
0x1a68   :  { %v2370_v41 = vmul.f32 0.015625, %v2366_v50 }
0x1a69   :  { %v2369_v11 = vpop.xlane.xlu0 %2368 }
0x1a6a   :  { %v2372_v5 = vadd.f32 1e-05, %v2370_v41  ;;  %v2371_v33 = vmul.f32 0.015625, %v2369_v11 }
0x1a6c   :  { %3153 = vrsqrt.f32 %v2372_v5  ;;  %v2373_v54 = vadd.f32 1e-05, %v2371_v33 }
0x1a6e   :  { %3155 = vrsqrt.f32 %v2373_v54 }
0x1a76   :  { %v3154_v29 = vpop.eup %3153 }
0x1a77   :  { %v2376_v56 = vmul.f32 %v3154_v29, %v2360_v38 }
0x1a78   :  { %v3156_v57 = vpop.eup %3155 }
0x1a79   :  { %v2384_v59 = vmul.f32 %v2698_v52, %v2376_v56  ;;  %v2377_v60 = vmul.f32 %v3156_v57, %v2361_v40 }
0x1a7b   :  { %v2385_v62 = vmul.f32 %v2698_v52, %v2377_v60  ;;  %v2392_v63 = vadd.f32 %v2699_v61, %v2384_v59 }
0x1a7d   :  { %v2393_v1 = vadd.f32 %v2699_v61, %v2385_v62 }
0x1a7f   :  { %v2394_v3 = vpack.c.bf16 %v2393_v1, %v2392_v63 }
0x1a81   :  { %2967 = vmatmul.mubr.msk.bf16.vlgmr.msra.gmra.mrb[52].mxu0 %vm669_vm3, %v2394_v3 }
0x1b54   :  { %v2471_v7 = vpop.f32.mrb[52].mxu0 }
0x1b55   :  { %v2472_v53 = vadd.f32 %v2700_v58, %v2471_v7  ;;  %v2968_v8 = vpop.f32.mrb[53].mxu0 }
0x1b56   :  { %v2474_v47 = vpop.f32.mrb[54].mxu0 }
0x1b57   :  { %v2480_v55 = vmul.f32 0.01, %v2472_v53  ;;  %v2475_v9 = vadd.f32 %v2700_v58, %v2474_v47  ;;  %v2969_v10 = vpop.f32.mrb[55].mxu0  ;;  %vm2478_vm6 = vcmp.ge.f32.partialorder %v2472_v53, 0.0 }
0x1b59   :  { %vm2479_vm7 = vcmp.ge.f32.partialorder %v2475_v9, 0.0  ;;  %v2481_v12 = vmul.f32 0.01, %v2475_v9  ;;  %v2482_v13 = vsel %vm2478_vm6, %v2472_v53, %v2480_v55 }
0x1b5b   :  { %v2483_v14 = vsel %vm2479_vm7, %v2475_v9, %v2481_v12 }
0x1b5c   :  { %v2484_v15 = vpack.c.bf16 %v2483_v14, %v2482_v13 }
0x1b5e   :  { %2975 = vmatmul.mubr.msk.bf16.vlgmr.msra.gmra.mrb[52].mxu1 %vm424_vm1, %v2484_v15 }
0x1c31   :  { %v2545_v48 = vpop.f32.mrb[52].mxu1 }
0x1c32   :  { %v2546_v16 = vadd.f32 %v2706_v0, %v2545_v48  ;;  %v2976_v51 = vpop.f32.mrb[53].mxu1 }
0x1c33   :  { %v2548_v17 = vpop.f32.mrb[54].mxu1 }
0x1c34   :  { %2552 = vst [vmem:[#allocation35] sm:$0xff] %v2546_v16  ;;  %v2549_v18 = vadd.f32 %v2706_v0, %v2548_v17  ;;  %v2977_v19 = vpop.f32.mrb[55].mxu1 }
0x1c36   :  { %2553 = vst [vmem:[#allocation35 + $0x8] sm:$0xff] %v2549_v18 }
0x1c37   :  { %3630 = shalt.err (!%p3627_p4)
}
0x1c38   :  { %s3631_s12 = scalar_lea.hbm %s3909_s27, 256 }
0x1c39   :  { %p3632_p5 = scmp.ne.s32.totalorder %s3909_s27, %s3631_s12  ;;  %p3635_p6 = scmp.lt.u32.totalorder %s3631_s12, %s3909_s27 }
0x1c3b   :  { %p3637_p7 = pnand %p3635_p6, %p3632_p5 }
0x1c3d   :  { %3640 = shalt.err (!%p3637_p7)
}
0x1c3e   :  { %s3729_s30 = smov 128   ;;  %s3730_s25 = smov 8  }
0x1c3f   :  { %2565 = dma.vmem_to_hbm [thread:$0]  %s2560_s19, 256, %s3909_s27, [#allocation4], %s3729_s30, %s3729_s30, %s3730_s25  }
0x1c40   :  { %3663 = dma.done.wait [#allocation4], 256  }
0x1c41   :  { %3664 = vsyncadd [#allocation4], 4294967040 }
0x1c42   :  { %2569 = vsyncpa [#allocation3], 1 }
0x1c43   :  { %2570 = vsyncpa [#allocation6], 1 }
0x1c44   :  { %2571 = vsyncpa [#allocation9], 1 }
0x1c45   :  { %2572 = vsyncpa [#allocation12], 1 }
0x1c46   :  { %2573 = vsyncpa [#allocation15], 1 }
0x1c47   :  { %2574 = vsyncpa [#allocation18], 1 }
0x1c48   :  { %2575 = vsyncpa [#allocation21], 1 }
0x1c49   :  { %2576 = vsyncpa [#allocation24], 1 }
0x1c4a   :  { %2577 = vsyncpa [#allocation27], 1 }
0x1c4b   :  { %2578 = vsyncpa [#allocation30], 1 }
0x1c4c   :  { %2579 = vsyncpa [#allocation33], 1 }
0x1c4d   :  { %2580 = vsyncpa [#allocation4], 1 }

</bundles_post_ra>
